<compile_context>
chip_gen: v6e
topology: v6e:2x2x1
jax: 0.10.0
libtpu: 0.0.40
codegen_flags: <defaults>
</compile_context>

<pallas_src>
import functools

import jax
import jax.numpy as jnp
from jax.experimental import pallas as pl
from jax.experimental.pallas import tpu as pltpu

BN_EPS = 1e-5

# Row indices inside the stacked small-parameter array (shape (8, hidden), f32).
_G1, _BE1, _G2, _BE2, _G3, _BE3, _W4, _B4 = range(8)


def _bn_relu(z, gamma, beta):
    """Training-mode BatchNorm1d (batch mean, biased variance) fused with ReLU.

    z: (B, N) f32; gamma/beta: (1, N) f32.
    Single pass over z for both moments, fused affine: 2 VPU ops per element.
    Variance is clamped at 0 so the one-pass E[z^2]-mu^2 formula cannot go
    (slightly) negative under cancellation and NaN the rsqrt.
    """
    inv_n = 1.0 / z.shape[0]
    mu = jnp.sum(z, axis=0, keepdims=True) * inv_n
    ez2 = jnp.sum(z * z, axis=0, keepdims=True) * inv_n
    var = jnp.maximum(ez2 - mu * mu, 0.0)       # biased variance, clamped >= 0
    s = gamma * jax.lax.rsqrt(var + BN_EPS)     # fused scale (EUP rsqrt)
    t = beta - mu * s                           # fused shift
    return jnp.maximum(z * s + t, 0.0)


def mlp_kernel(x_ref, w1_ref, w2_ref, w3_ref, p_ref, o_ref,
               *, activate_output: bool):
    bf16 = jnp.bfloat16

    # Layer 1: (B, dim) @ (dim, H). Linear bias omitted: cancelled by BN mean-sub.
    x = x_ref[...].astype(bf16)                 # in-kernel cast (x arrives as f32)
    h = jnp.dot(x, w1_ref[...], preferred_element_type=jnp.float32)
    h = _bn_relu(h, p_ref[_G1:_G1 + 1, :], p_ref[_BE1:_BE1 + 1, :])

    h = jnp.dot(h.astype(bf16), w2_ref[...], preferred_element_type=jnp.float32)
    h = _bn_relu(h, p_ref[_G2:_G2 + 1, :], p_ref[_BE2:_BE2 + 1, :])

    h = jnp.dot(h.astype(bf16), w3_ref[...], preferred_element_type=jnp.float32)
    h = _bn_relu(h, p_ref[_G3:_G3 + 1, :], p_ref[_BE3:_BE3 + 1, :])

    # Layer 4 (H -> 1) on VPU + XLU lane-reduce: no padded weight, no MXU pass.
    w4_row = p_ref[_W4:_W4 + 1, :]              # (1, H) f32
    b4 = p_ref[_B4:_B4 + 1, :][:, :1]           # (1, 1) f32 (row is b4 broadcast)
    out = jnp.sum(h * w4_row, axis=-1, keepdims=True) + b4
    if activate_output:
        out = jnp.maximum(out, 0.0)
    o_ref[...] = out.astype(o_ref.dtype)


def prepare_params(params):
    """One-time prep reused across calls: cast w1..w3 to bf16, stack every small
    per-feature parameter (BN gamma/beta, w4^T, b4) into a single (8, hidden) f32
    array (one DMA / one VMEM tile), and drop the BN-cancelled biases b1..b3."""
    bf16 = jnp.bfloat16
    hidden = params["w4"].shape[0]
    w4t = params["w4"].astype(jnp.float32).reshape(1, hidden)          # (1, H)
    b4row = jnp.broadcast_to(
        params["b4"].astype(jnp.float32).reshape(1, 1), (1, hidden))   # (1, H)
    stacked = jnp.concatenate(
        [params["g1"], params["be1"],
         params["g2"], params["be2"],
         params["g3"], params["be3"],
         w4t, b4row],
        axis=0).astype(jnp.float32)                                    # (8, H)
    return dict(
        w1=params["w1"].astype(bf16),
        w2=params["w2"].astype(bf16),
        w3=params["w3"].astype(bf16),
        small=stacked,
    )


def mlp_forward(x, prepped, activate_output=False):
    """x: (B, ...) -> flattened to (B, dim). Returns (B, 1) f32."""
    B = x.shape[0]
    x2d = x.reshape(B, -1)                       # stays f32; cast happens in-kernel

    vmem = pl.BlockSpec(memory_space=pltpu.MemorySpace.VMEM)
    kernel = functools.partial(mlp_kernel, activate_output=activate_output)

    out = pl.pallas_call(
        kernel,
        out_shape=jax.ShapeDtypeStruct((B, 1), jnp.float32),
        in_specs=[vmem] * 5,
        out_specs=vmem,
    )(x2d, prepped["w1"], prepped["w2"], prepped["w3"], prepped["small"])
    return out


def init_params(key, dim=784, hidden=300):
    ks = jax.random.split(key, 4)

    def linear(k, fan_in, fan_out):
        # PyTorch-like uniform init in [-1/sqrt(fan_in), 1/sqrt(fan_in)] for W and b.
        kw, kb = jax.random.split(k)
        bound = 1.0 / jnp.sqrt(float(fan_in))
        w = jax.random.uniform(kw, (fan_in, fan_out), jnp.float32, -bound, bound)
        b = jax.random.uniform(kb, (1, fan_out), jnp.float32, -bound, bound)
        return w, b

    w1, b1 = linear(ks[0], dim, hidden)
    w2, b2 = linear(ks[1], hidden, hidden)
    w3, b3 = linear(ks[2], hidden, hidden)
    w4, b4 = linear(ks[3], hidden, 1)
    ones = lambda n: jnp.ones((1, n), jnp.float32)
    zeros = lambda n: jnp.zeros((1, n), jnp.float32)
    return dict(
        w1=w1, b1=b1, g1=ones(hidden), be1=zeros(hidden),
        w2=w2, b2=b2, g2=ones(hidden), be2=zeros(hidden),
        w3=w3, b3=b3, g3=ones(hidden), be3=zeros(hidden),
        w4=w4, b4=b4,
    )


def mlp_reference(x, params, activate_output=False):
    """Pure-JAX reference matching the PyTorch training-mode forward (including the
    l1..l3 biases, which BN cancels), with the same precision choices as the kernel
    (bf16 matmul operands / f32 accumulation for layers 1-3, f32 VPU layer 4)."""
    h = x.reshape(x.shape[0], -1).astype(jnp.float32)

    def dot_bf16(a, w):
        return jnp.dot(a.astype(jnp.bfloat16), w.astype(jnp.bfloat16),
                       preferred_element_type=jnp.float32)

    def bn_relu(z, g, b):
        mu = jnp.mean(z, axis=0, keepdims=True)
        var = jnp.mean((z - mu) ** 2, axis=0, keepdims=True)
        return jnp.maximum((z - mu) / jnp.sqrt(var + BN_EPS) * g + b, 0.0)

    h = bn_relu(dot_bf16(h, params["w1"]) + params["b1"], params["g1"], params["be1"])
    h = bn_relu(dot_bf16(h, params["w2"]) + params["b2"], params["g2"], params["be2"])
    h = bn_relu(dot_bf16(h, params["w3"]) + params["b3"], params["g3"], params["be3"])
    out = jnp.dot(h, params["w4"]) + params["b4"]     # f32, like the kernel's layer 4
    if activate_output:
        out = jnp.maximum(out, 0.0)
    return out


if __name__ == "__main__":
    key = jax.random.PRNGKey(0)
    k_x, k_p = jax.random.split(key)

    B, C, H, W = 8, 1, 28, 28            # flattens to dim = 784 as the module expects
    x = jax.random.normal(k_x, (B, C, H, W), jnp.float32)
    params = init_params(k_p, dim=C * H * W, hidden=300)
    prepped = prepare_params(params)     # one-time: bf16 cast + small-param stacking

    out = mlp_forward(x, prepped, activate_output=False)
    out = jax.block_until_ready(out)

    ref = mlp_reference(x, params, activate_output=False)
    assert out.shape == (B, 1)
    max_diff = float(jnp.max(jnp.abs(out - ref)))
    assert jnp.allclose(out, ref, atol=2e-3, rtol=2e-3), \
        f"mismatch vs reference (max abs diff {max_diff})"

    print("KERNEL_OK")
</pallas_src>

<mosaic_0001>
module attributes {stable_mosaic.version = 11 : i64} {
  func.func @mlp_kernel(%arg0: memref<8x784xf32, #tpu.memory_space<vmem>>, %arg1: memref<784x300xbf16, #tpu.memory_space<vmem>>, %arg2: memref<300x300xbf16, #tpu.memory_space<vmem>>, %arg3: memref<300x300xbf16, #tpu.memory_space<vmem>>, %arg4: memref<8x300xf32, #tpu.memory_space<vmem>>, %arg5: memref<8x1xf32, #tpu.memory_space<vmem>>) attributes {dimension_semantics = [], scalar_prefetch = 0 : i64, scratch_operands = 0 : i64, tpu.core_type = #tpu.core_type<tc>} {
    %c0 = arith.constant 0 : index
    %c0_0 = arith.constant 0 : index
    %0 = vector.load %arg0[%c0, %c0_0] : memref<8x784xf32, #tpu.memory_space<vmem>>, vector<8x784xf32>
    %1 = arith.truncf %0 : vector<8x784xf32> to vector<8x784xbf16>
    %c0_1 = arith.constant 0 : index
    %c0_2 = arith.constant 0 : index
    %2 = vector.load %arg1[%c0_1, %c0_2] : memref<784x300xbf16, #tpu.memory_space<vmem>>, vector<784x300xbf16>
    %cst = arith.constant dense<0.000000e+00> : vector<8x300xf32>
    %3 = tpu.matmul %1, %2, %cst {dimension_numbers = #tpu.dot_dimension_numbers<[1], [0], [0], [1], [0, 0, 1, 1], [], []>} : vector<8x784xbf16>, vector<784x300xbf16>, vector<8x300xf32> -> vector<8x300xf32>
    %c0_3 = arith.constant 0 : index
    %c0_4 = arith.constant 0 : index
    %4 = vector.load %arg4[%c0_3, %c0_4] : memref<8x300xf32, #tpu.memory_space<vmem>>, vector<1x300xf32>
    %c1 = arith.constant 1 : index
    %c0_5 = arith.constant 0 : index
    %5 = vector.load %arg4[%c1, %c0_5] : memref<8x300xf32, #tpu.memory_space<vmem>>, vector<1x300xf32>
    %cst_6 = arith.constant dense<0.000000e+00> : vector<300xf32>
    %6 = vector.multi_reduction <add>, %3, %cst_6 [0] : vector<8x300xf32> to vector<300xf32>
    %7 = vector.shape_cast %6 : vector<300xf32> to vector<1x300xf32>
    %cst_7 = arith.constant 1.250000e-01 : f32
    %8 = vector.broadcast %cst_7 : f32 to vector<1x300xf32>
    %9 = arith.mulf %7, %8 : vector<1x300xf32>
    %10 = arith.mulf %3, %3 : vector<8x300xf32>
    %cst_8 = arith.constant dense<0.000000e+00> : vector<300xf32>
    %11 = vector.multi_reduction <add>, %10, %cst_8 [0] : vector<8x300xf32> to vector<300xf32>
    %12 = vector.shape_cast %11 : vector<300xf32> to vector<1x300xf32>
    %cst_9 = arith.constant 1.250000e-01 : f32
    %13 = vector.broadcast %cst_9 : f32 to vector<1x300xf32>
    %14 = arith.mulf %12, %13 : vector<1x300xf32>
    %15 = arith.mulf %9, %9 : vector<1x300xf32>
    %16 = arith.subf %14, %15 : vector<1x300xf32>
    %cst_10 = arith.constant 0.000000e+00 : f32
    %17 = vector.broadcast %cst_10 : f32 to vector<1x300xf32>
    %18 = arith.maximumf %16, %17 : vector<1x300xf32>
    %cst_11 = arith.constant 9.99999974E-6 : f32
    %19 = vector.broadcast %cst_11 : f32 to vector<1x300xf32>
    %20 = arith.addf %18, %19 : vector<1x300xf32>
    %21 = math.rsqrt %20 : vector<1x300xf32>
    %22 = arith.mulf %4, %21 : vector<1x300xf32>
    %23 = arith.mulf %9, %22 : vector<1x300xf32>
    %24 = arith.subf %5, %23 : vector<1x300xf32>
    %25 = vector.broadcast %22 : vector<1x300xf32> to vector<8x300xf32>
    %26 = arith.mulf %3, %25 : vector<8x300xf32>
    %27 = vector.broadcast %24 : vector<1x300xf32> to vector<8x300xf32>
    %28 = arith.addf %26, %27 : vector<8x300xf32>
    %cst_12 = arith.constant 0.000000e+00 : f32
    %29 = vector.broadcast %cst_12 : f32 to vector<8x300xf32>
    %30 = arith.maximumf %28, %29 : vector<8x300xf32>
    %31 = arith.truncf %30 : vector<8x300xf32> to vector<8x300xbf16>
    %c0_13 = arith.constant 0 : index
    %c0_14 = arith.constant 0 : index
    %32 = vector.load %arg2[%c0_13, %c0_14] : memref<300x300xbf16, #tpu.memory_space<vmem>>, vector<300x300xbf16>
    %cst_15 = arith.constant dense<0.000000e+00> : vector<8x300xf32>
    %33 = tpu.matmul %31, %32, %cst_15 {dimension_numbers = #tpu.dot_dimension_numbers<[1], [0], [0], [1], [0, 0, 1, 1], [], []>} : vector<8x300xbf16>, vector<300x300xbf16>, vector<8x300xf32> -> vector<8x300xf32>
    %c2 = arith.constant 2 : index
    %c0_16 = arith.constant 0 : index
    %34 = vector.load %arg4[%c2, %c0_16] : memref<8x300xf32, #tpu.memory_space<vmem>>, vector<1x300xf32>
    %c3 = arith.constant 3 : index
    %c0_17 = arith.constant 0 : index
    %35 = vector.load %arg4[%c3, %c0_17] : memref<8x300xf32, #tpu.memory_space<vmem>>, vector<1x300xf32>
    %cst_18 = arith.constant dense<0.000000e+00> : vector<300xf32>
    %36 = vector.multi_reduction <add>, %33, %cst_18 [0] : vector<8x300xf32> to vector<300xf32>
    %37 = vector.shape_cast %36 : vector<300xf32> to vector<1x300xf32>
    %cst_19 = arith.constant 1.250000e-01 : f32
    %38 = vector.broadcast %cst_19 : f32 to vector<1x300xf32>
    %39 = arith.mulf %37, %38 : vector<1x300xf32>
    %40 = arith.mulf %33, %33 : vector<8x300xf32>
    %cst_20 = arith.constant dense<0.000000e+00> : vector<300xf32>
    %41 = vector.multi_reduction <add>, %40, %cst_20 [0] : vector<8x300xf32> to vector<300xf32>
    %42 = vector.shape_cast %41 : vector<300xf32> to vector<1x300xf32>
    %cst_21 = arith.constant 1.250000e-01 : f32
    %43 = vector.broadcast %cst_21 : f32 to vector<1x300xf32>
    %44 = arith.mulf %42, %43 : vector<1x300xf32>
    %45 = arith.mulf %39, %39 : vector<1x300xf32>
    %46 = arith.subf %44, %45 : vector<1x300xf32>
    %cst_22 = arith.constant 0.000000e+00 : f32
    %47 = vector.broadcast %cst_22 : f32 to vector<1x300xf32>
    %48 = arith.maximumf %46, %47 : vector<1x300xf32>
    %cst_23 = arith.constant 9.99999974E-6 : f32
    %49 = vector.broadcast %cst_23 : f32 to vector<1x300xf32>
    %50 = arith.addf %48, %49 : vector<1x300xf32>
    %51 = math.rsqrt %50 : vector<1x300xf32>
    %52 = arith.mulf %34, %51 : vector<1x300xf32>
    %53 = arith.mulf %39, %52 : vector<1x300xf32>
    %54 = arith.subf %35, %53 : vector<1x300xf32>
    %55 = vector.broadcast %52 : vector<1x300xf32> to vector<8x300xf32>
    %56 = arith.mulf %33, %55 : vector<8x300xf32>
    %57 = vector.broadcast %54 : vector<1x300xf32> to vector<8x300xf32>
    %58 = arith.addf %56, %57 : vector<8x300xf32>
    %cst_24 = arith.constant 0.000000e+00 : f32
    %59 = vector.broadcast %cst_24 : f32 to vector<8x300xf32>
    %60 = arith.maximumf %58, %59 : vector<8x300xf32>
    %61 = arith.truncf %60 : vector<8x300xf32> to vector<8x300xbf16>
    %c0_25 = arith.constant 0 : index
    %c0_26 = arith.constant 0 : index
    %62 = vector.load %arg3[%c0_25, %c0_26] : memref<300x300xbf16, #tpu.memory_space<vmem>>, vector<300x300xbf16>
    %cst_27 = arith.constant dense<0.000000e+00> : vector<8x300xf32>
    %63 = tpu.matmul %61, %62, %cst_27 {dimension_numbers = #tpu.dot_dimension_numbers<[1], [0], [0], [1], [0, 0, 1, 1], [], []>} : vector<8x300xbf16>, vector<300x300xbf16>, vector<8x300xf32> -> vector<8x300xf32>
    %c4 = arith.constant 4 : index
    %c0_28 = arith.constant 0 : index
    %64 = vector.load %arg4[%c4, %c0_28] : memref<8x300xf32, #tpu.memory_space<vmem>>, vector<1x300xf32>
    %c5 = arith.constant 5 : index
    %c0_29 = arith.constant 0 : index
    %65 = vector.load %arg4[%c5, %c0_29] : memref<8x300xf32, #tpu.memory_space<vmem>>, vector<1x300xf32>
    %cst_30 = arith.constant dense<0.000000e+00> : vector<300xf32>
    %66 = vector.multi_reduction <add>, %63, %cst_30 [0] : vector<8x300xf32> to vector<300xf32>
    %67 = vector.shape_cast %66 : vector<300xf32> to vector<1x300xf32>
    %cst_31 = arith.constant 1.250000e-01 : f32
    %68 = vector.broadcast %cst_31 : f32 to vector<1x300xf32>
    %69 = arith.mulf %67, %68 : vector<1x300xf32>
    %70 = arith.mulf %63, %63 : vector<8x300xf32>
    %cst_32 = arith.constant dense<0.000000e+00> : vector<300xf32>
    %71 = vector.multi_reduction <add>, %70, %cst_32 [0] : vector<8x300xf32> to vector<300xf32>
    %72 = vector.shape_cast %71 : vector<300xf32> to vector<1x300xf32>
    %cst_33 = arith.constant 1.250000e-01 : f32
    %73 = vector.broadcast %cst_33 : f32 to vector<1x300xf32>
    %74 = arith.mulf %72, %73 : vector<1x300xf32>
    %75 = arith.mulf %69, %69 : vector<1x300xf32>
    %76 = arith.subf %74, %75 : vector<1x300xf32>
    %cst_34 = arith.constant 0.000000e+00 : f32
    %77 = vector.broadcast %cst_34 : f32 to vector<1x300xf32>
    %78 = arith.maximumf %76, %77 : vector<1x300xf32>
    %cst_35 = arith.constant 9.99999974E-6 : f32
    %79 = vector.broadcast %cst_35 : f32 to vector<1x300xf32>
    %80 = arith.addf %78, %79 : vector<1x300xf32>
    %81 = math.rsqrt %80 : vector<1x300xf32>
    %82 = arith.mulf %64, %81 : vector<1x300xf32>
    %83 = arith.mulf %69, %82 : vector<1x300xf32>
    %84 = arith.subf %65, %83 : vector<1x300xf32>
    %85 = vector.broadcast %82 : vector<1x300xf32> to vector<8x300xf32>
    %86 = arith.mulf %63, %85 : vector<8x300xf32>
    %87 = vector.broadcast %84 : vector<1x300xf32> to vector<8x300xf32>
    %88 = arith.addf %86, %87 : vector<8x300xf32>
    %cst_36 = arith.constant 0.000000e+00 : f32
    %89 = vector.broadcast %cst_36 : f32 to vector<8x300xf32>
    %90 = arith.maximumf %88, %89 : vector<8x300xf32>
    %c6 = arith.constant 6 : index
    %c0_37 = arith.constant 0 : index
    %91 = vector.load %arg4[%c6, %c0_37] : memref<8x300xf32, #tpu.memory_space<vmem>>, vector<1x300xf32>
    %c7 = arith.constant 7 : index
    %c0_38 = arith.constant 0 : index
    %92 = vector.load %arg4[%c7, %c0_38] : memref<8x300xf32, #tpu.memory_space<vmem>>, vector<1x300xf32>
    %93 = vector.extract_strided_slice %92 {offsets = [0, 0], sizes = [1, 1], strides = [1, 1]} : vector<1x300xf32> to vector<1x1xf32>
    %94 = vector.broadcast %91 : vector<1x300xf32> to vector<8x300xf32>
    %95 = arith.mulf %90, %94 : vector<8x300xf32>
    %cst_39 = arith.constant dense<0.000000e+00> : vector<8xf32>
    %96 = vector.multi_reduction <add>, %95, %cst_39 [1] : vector<8x300xf32> to vector<8xf32>
    %97 = vector.shape_cast %96 : vector<8xf32> to vector<8x1xf32>
    %98 = vector.broadcast %93 : vector<1x1xf32> to vector<8x1xf32>
    %99 = arith.addf %97, %98 : vector<8x1xf32>
    %c0_40 = arith.constant 0 : index
    %c0_41 = arith.constant 0 : index
    %100 = vector.load %arg5[%c0_40, %c0_41] : memref<8x1xf32, #tpu.memory_space<vmem>>, vector<8x1xf32>
    tpu.vector_store %arg5[%c0_40, %c0_41], %99 {strides = array<i32>} : memref<8x1xf32, #tpu.memory_space<vmem>>, vector<8x1xf32>,
    return
  }
}

</mosaic_0001>

<bundles_post_ra>
// kernel: tpu_custom_call.1
= control target key start
LH: loop header
LB: loop body
LE: loop exit
PB: predicated region body
PF: predicated region fallthrough
CT: control target
= control target key end

     0   :  { %vm1015_vm0 = vcmask 130048   ;;  %vm3785_vm1 = vmmov 0   ;;  %vm1892_vm2 = vcmask 1045504   ;;  %vm1358_vm3 = vcmask 359424   ;;  %s4834_s1 = inlined_call_operand.vmem [shape: bf16[784,300], index: 1, kind: input, shape index: {}]   ;;  %s4835_s0 = inlined_call_operand.vmem [shape: f32[8,784], index: 0, kind: input, shape index: {}]   ;;  %s4836_s2 = inlined_call_operand.vmem [shape: bf16[300,300], index: 2, kind: input, shape index: {}]   ;;  %s4837_s4 = inlined_call_operand.vmem [shape: f32[8,300], index: 4, kind: input, shape index: {}]   ;;  %s4838_s3 = inlined_call_operand.vmem [shape: bf16[300,300], index: 3, kind: input, shape index: {}]   ;;  %s4839_s5 = inlined_call_operand.vmem [shape: f32[8,1], index: 5, kind: output, shape index: {}]  }
   0x1   :  { %v3417_v0 = vld [vmem:[%s4834_s1 + $0xac] ss:$12 sps:$4 sm:$0xff]   ;;  %v3421_v2 = vld [vmem:[%s4834_s1 + $0xa8] ss:$12 sps:$4 sm:$0xff]   ;;  %v3427_v6 = vld [vmem:[%s4834_s1 + $0x90] ss:$12 sps:$4 sm:$0xff]  }
   0x2   :  { %v3419_v1 = vld [vmem:[%s4834_s1 + $0x22c] ss:$12 sps:$4 sm:$0xff]   ;;  %1019 = vmatprep.subr.bf16.mxu0 %v3417_v0  ;;  %v3422_v3 = vld [vmem:[%s4834_s1 + $0x228] ss:$12 sps:$4 sm:$0xff]   ;;  %v3428_v7 = vld [vmem:[%s4834_s1 + $0x210] ss:$12 sps:$4 sm:$0xff]  }
   0x3   :  { %1060 = vmatprep.subr.bf16.mxu1 %v3419_v1  ;;  %v3423_v4 = vld [vmem:[%s4834_s1 + $0x94] ss:$12 sps:$4 sm:$0xff]   ;;  %1020 = vmatpush1.bf16.msra.mxu0 %v3421_v2  ;;  %v3429_v8 = vld [vmem:[%s4834_s1 + $0x7c] ss:$12 sps:$4 sm:$0xff]   ;;  %v3433_v10 = vld [vmem:[%s4834_s1 + $0x78] ss:$12 sps:$4 sm:$0xff]  }
   0x4   :  { %1061 = vmatpush1.bf16.msra.mxu1 %v3422_v3  ;;  %v3425_v5 = vld [vmem:[%s4834_s1 + $0x214] ss:$12 sps:$4 sm:$0xff]   ;;  %1021 = vmatprep.subr.bf16.mxu0 %v3423_v4  ;;  %v3431_v9 = vld [vmem:[%s4834_s1 + $0x1fc] ss:$12 sps:$4 sm:$0xff]   ;;  %v3434_v11 = vld [vmem:[%s4834_s1 + $0x1f8] ss:$12 sps:$4 sm:$0xff]  }
   0x5   :  { %1062 = vmatprep.subr.bf16.mxu1 %v3425_v5  ;;  %v3435_v12 = vld [vmem:[%s4834_s1 + $0x64] ss:$12 sps:$4 sm:$0xff]   ;;  %v3439_v14 = vld [vmem:[%s4834_s1 + $0x60] ss:$12 sps:$4 sm:$0xff]   ;;  %v3445_v18 = vld [vmem:[%s4834_s1 + $0x48] ss:$12 sps:$4 sm:$0xff]  }
   0x6   :  { %v3437_v13 = vld [vmem:[%s4834_s1 + $0x1e4] ss:$12 sps:$4 sm:$0xff]   ;;  %v3440_v15 = vld [vmem:[%s4834_s1 + $0x1e0] ss:$12 sps:$4 sm:$0xff]   ;;  %v3446_v19 = vld [vmem:[%s4834_s1 + $0x1c8] ss:$12 sps:$4 sm:$0xff]  }
   0x7   :  { %1022 = vmatpush1.bf16.msra.mxu0 %v3427_v6  ;;  %v3441_v16 = vld [vmem:[%s4834_s1 + $0x4c] ss:$12 sps:$4 sm:$0xff]   ;;  %v3447_v20 = vld [vmem:[%s4834_s1 + $0x34] ss:$12 sps:$4 sm:$0xff]   ;;  %v3451_v22 = vld [vmem:[%s4834_s1 + $0x30] ss:$12 sps:$4 sm:$0xff]  }
   0x8   :  { %1063 = vmatpush1.bf16.msra.mxu1 %v3428_v7  ;;  %1023 = vmatprep.subr.bf16.mxu0 %v3429_v8  ;;  %v3443_v17 = vld [vmem:[%s4834_s1 + $0x1cc] ss:$12 sps:$4 sm:$0xff]   ;;  %v3449_v21 = vld [vmem:[%s4834_s1 + $0x1b4] ss:$12 sps:$4 sm:$0xff]   ;;  %v3452_v23 = vld [vmem:[%s4834_s1 + $0x1b0] ss:$12 sps:$4 sm:$0xff]  }
   0x9   :  { %1064 = vmatprep.subr.bf16.mxu1 %v3431_v9  ;;  %v3453_v24 = vld [vmem:[%s4834_s1 + $0x1c] ss:$12 sps:$4 sm:$0xff]   ;;  %v3457_v26 = vld [vmem:[%s4834_s1 + $0x18] ss:$12 sps:$4 sm:$0xff]   ;;  %v3463_v30 = vld [vmem:[%s4834_s1] ss:$12 sps:$4 sm:$0xff]  }
   0xa   :  { %v3455_v25 = vld [vmem:[%s4834_s1 + $0x19c] ss:$12 sps:$4 sm:$0xff]   ;;  %v3458_v27 = vld [vmem:[%s4834_s1 + $0x198] ss:$12 sps:$4 sm:$0xff]   ;;  %v3464_v31 = vld [vmem:[%s4834_s1 + $0x180] ss:$12 sps:$4 sm:$0xff]  }
   0xb   :  { %1024 = vmatpush1.bf16.msra.mxu0 %v3433_v10  ;;  %v3459_v28 = vld [vmem:[%s4834_s1 + $0x4] ss:$12 sps:$4 sm:$0xff]   ;;  %v3465_v32 = vld [vmem:[%s4834_s1 + $0x16c] ss:$12 sps:$4 sm:$0xff]   ;;  %v3469_v34 = vld [vmem:[%s4834_s1 + $0x168] ss:$12 sps:$4 sm:$0xff]  }
   0xc   :  { %1065 = vmatpush1.bf16.msra.mxu1 %v3434_v11  ;;  %1025 = vmatprep.subr.bf16.mxu0 %v3435_v12  ;;  %v3461_v29 = vld [vmem:[%s4834_s1 + $0x184] ss:$12 sps:$4 sm:$0xff]   ;;  %v3467_v33 = vld [vmem:[%s4834_s1 + $0x2ec] ss:$12 sps:$4 sm:$0xff]   ;;  %v3470_v35 = vld [vmem:[%s4834_s1 + $0x2e8] ss:$12 sps:$4 sm:$0xff]  }
   0xd   :  { %1066 = vmatprep.subr.bf16.mxu1 %v3437_v13  ;;  %v3471_v36 = vld [vmem:[%s4834_s1 + $0x154] ss:$12 sps:$4 sm:$0xff]   ;;  %v3475_v38 = vld [vmem:[%s4834_s1 + $0x150] ss:$12 sps:$4 sm:$0xff]   ;;  %v3481_v42 = vld [vmem:[%s4834_s1 + $0x138] ss:$12 sps:$4 sm:$0xff]  }
   0xe   :  { %v3473_v37 = vld [vmem:[%s4834_s1 + $0x2d4] ss:$12 sps:$4 sm:$0xff]   ;;  %v3476_v39 = vld [vmem:[%s4834_s1 + $0x2d0] ss:$12 sps:$4 sm:$0xff]   ;;  %v3482_v43 = vld [vmem:[%s4834_s1 + $0x2b8] ss:$12 sps:$4 sm:$0xff]  }
   0xf   :  { %1026 = vmatpush1.bf16.msra.mxu0 %v3439_v14  ;;  %v3477_v40 = vld [vmem:[%s4834_s1 + $0x13c] ss:$12 sps:$4 sm:$0xff]   ;;  %v3483_v44 = vld [vmem:[%s4834_s1 + $0x124] ss:$12 sps:$4 sm:$0xff]   ;;  %v3487_v47 = vld [vmem:[%s4834_s1 + $0x120] ss:$12 sps:$4 sm:$0xff]  }
  0x10   :  { %1067 = vmatpush1.bf16.msra.mxu1 %v3440_v15  ;;  %1027 = vmatprep.subr.bf16.mxu0 %v3441_v16  ;;  %v3479_v41 = vld [vmem:[%s4834_s1 + $0x2bc] ss:$12 sps:$4 sm:$0xff]   ;;  %v3485_v45 = vld [vmem:[%s4834_s1 + $0x2a4] ss:$12 sps:$4 sm:$0xff]   ;;  %v3488_v48 = vld [vmem:[%s4834_s1 + $0x2a0] ss:$12 sps:$4 sm:$0xff]  }
  0x11   :  { %1068 = vmatprep.subr.bf16.mxu1 %v3443_v17  ;;  %v22_v46 = vld [vmem:[%s4835_s0 + $0x8] sm:$0xff]  ;;  %v24_v50 = vld [vmem:[%s4835_s0 + $0x18] sm:$0xff]  ;;  %v3495_v56 = vld [vmem:[%s4834_s1 + $0xf4] ss:$12 sps:$4 sm:$0xff]   ;;  %v3783_v16 = vmov 0   ;;  %vm2985_vm4 = vcmask 7168  }
  0x12   :  { %v3964_v49 = vpack.c.bf16 %v22_v46, %v22_v46  ;;  %v3489_v51 = vld [vmem:[%s4834_s1 + $0x10c] ss:$12 sps:$4 sm:$0xff]   ;;  %v3972_v52 = vpack.c.bf16 %v24_v50, %v24_v50  ;;  %v3493_v54 = vld [vmem:[%s4834_s1 + $0x108] ss:$12 sps:$4 sm:$0xff]   ;;  %v3499_v58 = vld [vmem:[%s4834_s1 + $0xf0] ss:$12 sps:$4 sm:$0xff]  }
  0x13   :  { %1028 = vmatpush1.bf16.msra.mxu0 %v3445_v18  ;;  %v3491_v53 = vld [vmem:[%s4834_s1 + $0x28c] ss:$12 sps:$4 sm:$0xff]   ;;  %v3494_v55 = vld [vmem:[%s4834_s1 + $0x288] ss:$12 sps:$4 sm:$0xff]   ;;  %v3500_v59 = vld [vmem:[%s4834_s1 + $0x270] ss:$12 sps:$4 sm:$0xff]  }
  0x14   :  { %1069 = vmatpush1.bf16.msra.mxu1 %v3446_v19  ;;  %1029 = vmatprep.subr.bf16.mxu0 %v3447_v20  ;;  %v3497_v57 = vld [vmem:[%s4834_s1 + $0x274] ss:$12 sps:$4 sm:$0xff]   ;;  %v3501_v60 = vld [vmem:[%s4834_s1 + $0xdc] ss:$12 sps:$4 sm:$0xff]   ;;  %v3505_v62 = vld [vmem:[%s4834_s1 + $0xd8] ss:$12 sps:$4 sm:$0xff]  }
  0x15   :  { %1070 = vmatprep.subr.bf16.mxu1 %v3449_v21  ;;  %1051 = vmatprep.mubr.bf16.mxu0 %v3964_v49  ;;  %v3503_v61 = vld [vmem:[%s4834_s1 + $0x25c] ss:$12 sps:$4 sm:$0xff]   ;;  %v3506_v63 = vld [vmem:[%s4834_s1 + $0x258] ss:$12 sps:$4 sm:$0xff]   ;;  %v3511_v2 = vld [vmem:[%s4834_s1 + $0xc0] ss:$12 sps:$4 sm:$0xff]  }
  0x16   :  { %1092 = vmatprep.mubr.bf16.mxu1 %v3972_v52  ;;  %v3507_v0 = vld [vmem:[%s4834_s1 + $0xc4] ss:$12 sps:$4 sm:$0xff]   ;;  %v3512_v3 = vld [vmem:[%s4834_s1 + $0x240] ss:$12 sps:$4 sm:$0xff]   ;;  %v3513_v10 = vld [vmem:[%s4834_s1 + $0x3a8] ss:$12 sps:$4 sm:$0xff]  }
  0x17   :  { %1030 = vmatpush1.bf16.msra.mxu0 %v3451_v22  ;;  %v3509_v1 = vld [vmem:[%s4834_s1 + $0x244] ss:$12 sps:$4 sm:$0xff]   ;;  %v3515_v6 = vld [vmem:[%s4834_s1 + $0x3ac] ss:$12 sps:$4 sm:$0xff]   ;;  %v3521_v12 = vld [vmem:[%s4834_s1 + $0x394] ss:$12 sps:$4 sm:$0xff]  }
  0x18   :  { %1071 = vmatpush1.bf16.msra.mxu1 %v3452_v23  ;;  %1031 = vmatprep.subr.bf16.mxu0 %v3453_v24  ;;  %v21_v4 = vld [vmem:[%s4835_s0] sm:$0xff]  ;;  %v23_v5 = vld [vmem:[%s4835_s0 + $0x10] sm:$0xff]  ;;  %v3525_v17 = vld [vmem:[%s4834_s1 + $0x37c] ss:$12 sps:$4 sm:$0xff]  }
  0x19   :  { %1072 = vmatprep.subr.bf16.mxu1 %v3455_v25  ;;  %v3518_v7 = vld [vmem:[%s4834_s1 + $0x484] ss:$12 sps:$4 sm:$0xff]   ;;  %v4033_v8 = vpack.c.bf16 %v21_v4, %v21_v4  ;;  %v4035_v9 = vpack.c.bf16 %v23_v5, %v23_v5  ;;  %v3516_v11 = vld [vmem:[%s4834_s1 + $0x480] ss:$12 sps:$4 sm:$0xff]   ;;  %v3557_v46 = vld [vmem:[%s4834_s1 + $0xc8] ss:$12 sps:$4 sm:$0xff]  }
  0x1a   :  { %v3522_v13 = vld [vmem:[%s4834_s1 + $0x170] ss:$12 sps:$4 sm:$0xff]   ;;  %v3523_v18 = vld [vmem:[%s4834_s1 + $0x378] ss:$12 sps:$4 sm:$0xff]   ;;  %v3528_v23 = vld [vmem:[%s4834_s1 + $0x360] ss:$12 sps:$4 sm:$0xff]  }
  0x1b   :  { %1032 = vmatpush1.bf16.msra.mxu0 %v3457_v26  ;;  %v3519_v14 = vld [vmem:[%s4834_s1 + $0x390] ss:$12 sps:$4 sm:$0xff]   ;;  %v3527_v21 = vld [vmem:[%s4834_s1 + $0x158] ss:$12 sps:$4 sm:$0xff]   ;;  %v3532_v25 = vld [vmem:[%s4834_s1 + $0x140] ss:$12 sps:$4 sm:$0xff]  }
  0x1c   :  { %1073 = vmatpush1.bf16.msra.mxu1 %v3458_v27  ;;  %1033 = vmatprep.subr.bf16.mxu0 %v3459_v28  ;;  %v27_v15 = vld [vmem:[%s4835_s0 + $0x30] sm:$0xff]  ;;  %v3531_v24 = vld [vmem:[%s4834_s1 + $0x98] ss:$12 sps:$4 sm:$0xff]   ;;  %v3536_v28 = vld [vmem:[%s4834_s1 + $0x80] ss:$12 sps:$4 sm:$0xff]  }
  0x1d   :  { %1074 = vmatprep.subr.bf16.mxu1 %v3461_v29  ;;  %v4064_v19 = vpack.c.bf16 %v27_v15, %v27_v15  ;;  %v3526_v20 = vld [vmem:[%s4834_s1 + $0xb0] ss:$12 sps:$4 sm:$0xff]   ;;  %v3535_v26 = vld [vmem:[%s4834_s1 + $0x34c] ss:$12 sps:$4 sm:$0xff]   ;;  %v3533_v27 = vld [vmem:[%s4834_s1 + $0x348] ss:$12 sps:$4 sm:$0xff]  }
  0x1e   :  { %v3530_v22 = vld [vmem:[%s4834_s1 + $0x364] ss:$12 sps:$4 sm:$0xff]   ;;  %v3537_v29 = vld [vmem:[%s4834_s1 + $0x128] ss:$12 sps:$4 sm:$0xff]  }
  0x1f   :  { %1034 = vmatpush1.bf16.msra.mxu0 %v3463_v30  ;;  %v3540_v30 = vld [vmem:[%s4834_s1 + $0x334] ss:$12 sps:$4 sm:$0xff]   ;;  %v3585_v4 = vld [vmem:[%s4834_s1 + $0x3dc] ss:$12 sps:$4 sm:$0xff]   ;;  %v3583_v5 = vld [vmem:[%s4834_s1 + $0x3d8] ss:$12 sps:$4 sm:$0xff]  }
  0x20   :  { %1075 = vmatpush1.bf16.msra.mxu1 %v3464_v31  ;;  %1035 = vmatprep.subr.bf16.mxu0 %v3465_v32  ;;  %v3538_v31 = vld [vmem:[%s4834_s1 + $0x330] ss:$12 sps:$4 sm:$0xff]   ;;  %v3541_v32 = vld [vmem:[%s4834_s1 + $0x68] ss:$12 sps:$4 sm:$0xff]  }
  0x21   :  { %1076 = vmatprep.subr.bf16.mxu1 %v3467_v33  ;;  %v3542_v33 = vld [vmem:[%s4834_s1 + $0x110] ss:$12 sps:$4 sm:$0xff]   ;;  %v3561_v50 = vld [vmem:[%s4834_s1 + $0x8] ss:$12 sps:$4 sm:$0xff]  }
  0x23   :  { %1036 = vmatpush2.bf16.msra.mxu0 %v3469_v34  ;;  %v3545_v34 = vld [vmem:[%s4834_s1 + $0x31c] ss:$12 sps:$4 sm:$0xff]  }
  0x24   :  { %1077 = vmatpush2.bf16.msra.mxu1 %v3470_v35  ;;  %1037 = vmatprep.subr.bf16.mxu0 %v3471_v36  ;;  %v3543_v35 = vld [vmem:[%s4834_s1 + $0x318] ss:$12 sps:$4 sm:$0xff]   ;;  %v3546_v36 = vld [vmem:[%s4834_s1 + $0x50] ss:$12 sps:$4 sm:$0xff]  }
  0x25   :  { %1078 = vmatprep.subr.bf16.mxu1 %v3473_v37  ;;  %v3547_v37 = vld [vmem:[%s4834_s1 + $0xf8] ss:$12 sps:$4 sm:$0xff]  }
  0x27   :  { %1038 = vmatpush2.bf16.msra.mxu0 %v3475_v38  ;;  %v3550_v38 = vld [vmem:[%s4834_s1 + $0x304] ss:$12 sps:$4 sm:$0xff]  }
  0x28   :  { %1079 = vmatpush2.bf16.msra.mxu1 %v3476_v39  ;;  %1039 = vmatprep.subr.bf16.mxu0 %v3477_v40  ;;  %v3548_v39 = vld [vmem:[%s4834_s1 + $0x300] ss:$12 sps:$4 sm:$0xff]   ;;  %v3551_v40 = vld [vmem:[%s4834_s1 + $0x38] ss:$12 sps:$4 sm:$0xff]  }
  0x29   :  { %1080 = vmatprep.subr.bf16.mxu1 %v3479_v41  ;;  %v3552_v41 = vld [vmem:[%s4834_s1 + $0xe0] ss:$12 sps:$4 sm:$0xff]  }
  0x2b   :  { %1040 = vmatpush2.bf16.msra.mxu0 %v3481_v42  ;;  %v3555_v42 = vld [vmem:[%s4834_s1 + $0x46c] ss:$12 sps:$4 sm:$0xff]  }
  0x2c   :  { %1081 = vmatpush2.bf16.msra.mxu1 %v3482_v43  ;;  %1041 = vmatprep.subr.bf16.mxu0 %v3483_v44  ;;  %v3553_v43 = vld [vmem:[%s4834_s1 + $0x468] ss:$12 sps:$4 sm:$0xff]  }
  0x2d   :  { %1082 = vmatprep.subr.bf16.mxu1 %v3485_v45  ;;  %v26_v44 = vld [vmem:[%s4835_s0 + $0x28] sm:$0xff] }
  0x2e   :  { %v3556_v45 = vld [vmem:[%s4834_s1 + $0x20] ss:$12 sps:$4 sm:$0xff]  }
  0x2f   :  { %1042 = vmatpush2.bf16.msra.mxu0 %v3487_v47  ;;  %v4150_v47 = vpack.c.bf16 %v26_v44, %v26_v44  ;;  %v3627_v44 = vld [vmem:[%s4836_s2 + $0x4c] ss:$12 sps:$4 sm:$0xff]  }
  0x30   :  { %1083 = vmatpush2.bf16.msra.mxu1 %v3488_v48  ;;  %1043 = vmatprep.subr.bf16.mxu0 %v3489_v51  ;;  %v3560_v48 = vld [vmem:[%s4834_s1 + $0x454] ss:$12 sps:$4 sm:$0xff]   ;;  %v3562_v51 = vld [vmem:[%s4834_s1 + $0x2f0] ss:$12 sps:$4 sm:$0xff]  }
  0x31   :  { %1084 = vmatprep.subr.bf16.mxu1 %v3491_v53  ;;  %v3565_v53 = vld [vmem:[%s4834_s1 + $0x43c] ss:$12 sps:$4 sm:$0xff]  }
  0x33   :  { %1044 = vmatpush2.bf16.msra.mxu0 %v3493_v54  ;;  %v3563_v54 = vld [vmem:[%s4834_s1 + $0x438] ss:$12 sps:$4 sm:$0xff]  }
  0x34   :  { %1085 = vmatpush2.bf16.msra.mxu1 %v3494_v55  ;;  %1045 = vmatprep.subr.bf16.mxu0 %v3495_v56  ;;  %v3566_v55 = vld [vmem:[%s4834_s1 + $0x230] ss:$12 sps:$4 sm:$0xff]   ;;  %v3567_v56 = vld [vmem:[%s4834_s1 + $0x2d8] ss:$12 sps:$4 sm:$0xff]  }
  0x35   :  { %1086 = vmatprep.subr.bf16.mxu1 %v3497_v57  ;;  %v3570_v57 = vld [vmem:[%s4834_s1 + $0x424] ss:$12 sps:$4 sm:$0xff]  }
  0x37   :  { %1046 = vmatpush2.bf16.msra.mxu0 %v3499_v58  ;;  %v3568_v58 = vld [vmem:[%s4834_s1 + $0x420] ss:$12 sps:$4 sm:$0xff]  }
  0x38   :  { %1087 = vmatpush2.bf16.msra.mxu1 %v3500_v59  ;;  %1047 = vmatprep.subr.bf16.mxu0 %v3501_v60  ;;  %v3571_v59 = vld [vmem:[%s4834_s1 + $0x218] ss:$12 sps:$4 sm:$0xff]   ;;  %v3572_v60 = vld [vmem:[%s4834_s1 + $0x2c0] ss:$12 sps:$4 sm:$0xff]  }
  0x39   :  { %1088 = vmatprep.subr.bf16.mxu1 %v3503_v61  ;;  %v3575_v61 = vld [vmem:[%s4834_s1 + $0x40c] ss:$12 sps:$4 sm:$0xff]  }
  0x3b   :  { %1048 = vmatpush2.bf16.msra.mxu0 %v3505_v62  ;;  %v3573_v62 = vld [vmem:[%s4834_s1 + $0x408] ss:$12 sps:$4 sm:$0xff]  }
  0x3c   :  { %1089 = vmatpush2.bf16.msra.mxu1 %v3506_v63  ;;  %1049 = vmatprep.subr.bf16.mxu0 %v3507_v0  ;;  %v3576_v63 = vld [vmem:[%s4834_s1 + $0x200] ss:$12 sps:$4 sm:$0xff]   ;;  %v3577_v0 = vld [vmem:[%s4834_s1 + $0x2a8] ss:$12 sps:$4 sm:$0xff]  }
  0x3d   :  { %1090 = vmatprep.subr.bf16.mxu1 %v3509_v1  ;;  %v3580_v1 = vld [vmem:[%s4834_s1 + $0x3f4] ss:$12 sps:$4 sm:$0xff]  }
  0x3f   :  { %1050 = vmatpush2.bf16.msra.mxu0 %v3511_v2  ;;  %v3581_v2 = vld [vmem:[%s4834_s1 + $0x1e8] ss:$12 sps:$4 sm:$0xff]  }
  0x40   :  { %1091 = vmatpush2.bf16.msra.mxu1 %v3512_v3  ;;  %1101 = vmatprep.subr.bf16.mxu0 %v3515_v6  ;;  %v3582_v3 = vld [vmem:[%s4834_s1 + $0x290] ss:$12 sps:$4 sm:$0xff]  }
  0x41   :  { %1156 = vmatprep.subr.bf16.mxu1 %v3518_v7  ;;  %v3586_v6 = vld [vmem:[%s4834_s1 + $0x1d0] ss:$12 sps:$4 sm:$0xff]   ;;  %v3587_v7 = vld [vmem:[%s4834_s1 + $0x278] ss:$12 sps:$4 sm:$0xff]  }
  0x42   :  { %1052 = vmatmul.mubr.bf16.vlgmr.msra.gmra.mxu0 %v4033_v8 }
  0x43   :  { %1093 = vmatmul.mubr.bf16.vlgmr.msra.gmra.mxu1 %v4035_v9  ;;  %1102 = vmatpush1.bf16.msra.mxu0 %v3513_v10  ;;  %v3588_v10 = vld [vmem:[%s4834_s1 + $0x3c0] ss:$12 sps:$4 sm:$0xff]  }
  0x44   :  { %1157 = vmatpush1.bf16.msra.mxu1 %v3516_v11  ;;  %1103 = vmatprep.subr.bf16.mxu0 %v3521_v12  ;;  %v3591_v11 = vld [vmem:[%s4834_s1 + $0x1b8] ss:$12 sps:$4 sm:$0xff]  }
  0x45   :  { %1174 = vmatprep.mubr.bf16.mxu1 %v3783_v16  ;;  %3267 = vmatprep.subr.bf16.mxu1 %v3522_v13  ;;  %v25_v12 = vld [vmem:[%s4835_s0 + $0x20] sm:$0xff] }
  0x46   :  { %1133 = vmatprep.mubr.bf16.mxu0 %v4150_v47  ;;  %v3592_v13 = vld [vmem:[%s4834_s1 + $0x260] ss:$12 sps:$4 sm:$0xff]   ;;  %v32_v15 = vpack.c.bf16 %v25_v12, %v25_v12 }
  0x47   :  { %1104 = vmatpush1.bf16.msra.mxu0 %v3519_v14  ;;  %v3594_v14 = vld [vmem:[%s4834_s1 + $0x470] ss:$12 sps:$4 sm:$0xff]   ;;  %v3652_v12 = vld [vmem:[%s4836_s2 + $0x1b4] ss:$12 sps:$4 sm:$0x3f]  }
  0x48   :  { %1105 = vmatprep.subr.bf16.mxu0 %v3525_v17  ;;  %v3593_v17 = vld [vmem:[%s4834_s1 + $0x1a0] ss:$12 sps:$4 sm:$0xff]  }
  0x4b   :  { %3138 = vmatmul.mubr.msk.bf16.vlgmr.msra.gmra.mxu1 %vm1015_vm0, %v4064_v19  ;;  %1106 = vmatpush1.bf16.msra.mxu0 %v3523_v18  ;;  %v3595_v18 = vld [vmem:[%s4834_s1 + $0x3b0] ss:$12 sps:$4 sm:$0xff]  }
  0x4c   :  { %3268 = vmatpush3.bf16.msra.mxu1 %v3526_v20  ;;  %1107 = vmatprep.subr.bf16.mxu0 %v3530_v22  ;;  %v3596_v20 = vld [vmem:[%s4834_s1 + $0x248] ss:$12 sps:$4 sm:$0xff]  }
  0x4d   :  { %3269 = vmatprep.subr.bf16.mxu1 %v3527_v21  ;;  %1215 = vmatprep.mubr.bf16.mxu1 %v3964_v49  ;;  %v3558_v49 = vld [vmem:[%s4834_s1 + $0x450] ss:$12 sps:$4 sm:$0xff]   ;;  %v3598_v21 = vld [vmem:[%s4834_s1 + $0x458] ss:$12 sps:$4 sm:$0xff]   ;;  %v3597_v22 = vld [vmem:[%s4834_s1 + $0x188] ss:$12 sps:$4 sm:$0xff]  }
  0x4f   :  { %1108 = vmatpush1.bf16.msra.mxu0 %v3528_v23  ;;  %v3599_v23 = vld [vmem:[%s4834_s1 + $0x398] ss:$12 sps:$4 sm:$0xff]  }
  0x50   :  { %3270 = vmatpush3.bf16.msra.mxu1 %v3531_v24  ;;  %1109 = vmatprep.subr.bf16.mxu0 %v3535_v26  ;;  %v3600_v24 = vld [vmem:[%s4834_s1 + $0x440] ss:$12 sps:$4 sm:$0xff]   ;;  %v3612_v26 = vld [vmem:[%s4834_s1 + $0x488] ss:$12 sps:$4 sm:$0xff]  }
  0x51   :  { %3271 = vmatprep.subr.bf16.mxu1 %v3532_v25  ;;  %v3601_v25 = vld [vmem:[%s4834_s1 + $0x380] ss:$12 sps:$4 sm:$0xff]  }
  0x53   :  { %1110 = vmatpush1.bf16.msra.mxu0 %v3533_v27  ;;  %v3602_v27 = vld [vmem:[%s4834_s1 + $0x428] ss:$12 sps:$4 sm:$0xff]  }
  0x54   :  { %3272 = vmatpush3.bf16.msra.mxu1 %v3536_v28  ;;  %1111 = vmatprep.subr.bf16.mxu0 %v3540_v30  ;;  %v3784_v28 = vmov 0.0   ;;  %v3604_v30 = vld [vmem:[%s4834_s1 + $0x410] ss:$12 sps:$4 sm:$0xff]  }
  0x55   :  { %3273 = vmatprep.subr.bf16.mxu1 %v3537_v29  ;;  %v3603_v29 = vld [vmem:[%s4834_s1 + $0x368] ss:$12 sps:$4 sm:$0xff]  }
  0x57   :  { %1112 = vmatpush1.bf16.msra.mxu0 %v3538_v31  ;;  %v3606_v31 = vld [vmem:[%s4834_s1 + $0x3f8] ss:$12 sps:$4 sm:$0xff]  }
  0x58   :  { %3274 = vmatpush3.bf16.msra.mxu1 %v3541_v32  ;;  %1113 = vmatprep.subr.bf16.mxu0 %v3545_v34  ;;  %v3607_v32 = vld [vmem:[%s4834_s1 + $0x338] ss:$12 sps:$4 sm:$0xff]   ;;  %v3609_v34 = vld [vmem:[%s4834_s1 + $0x320] ss:$12 sps:$4 sm:$0xff]  }
  0x59   :  { %3275 = vmatprep.subr.bf16.mxu1 %v3542_v33  ;;  %v3608_v33 = vld [vmem:[%s4834_s1 + $0x3e0] ss:$12 sps:$4 sm:$0xff]  }
  0x5b   :  { %1114 = vmatpush1.bf16.msra.mxu0 %v3543_v35  ;;  %v3611_v35 = vld [vmem:[%s4834_s1 + $0x308] ss:$12 sps:$4 sm:$0xff]  }
  0x5c   :  { %3276 = vmatpush3.bf16.msra.mxu1 %v3546_v36  ;;  %1115 = vmatprep.subr.bf16.mxu0 %v3550_v38  ;;  %v3615_v36 = vld [vmem:[%s4836_s2 + $0xac] ss:$12 sps:$4 sm:$0xff]   ;;  %v3618_v38 = vld [vmem:[%s4836_s2 + $0x94] ss:$12 sps:$4 sm:$0xff]  }
  0x5d   :  { %3277 = vmatprep.subr.bf16.mxu1 %v3547_v37  ;;  %v3613_v37 = vld [vmem:[%s4836_s2 + $0xa8] ss:$12 sps:$4 sm:$0xff]  }
  0x5f   :  { %1116 = vmatpush1.bf16.msra.mxu0 %v3548_v39  ;;  %v3616_v39 = vld [vmem:[%s4836_s2 + $0x90] ss:$12 sps:$4 sm:$0xff]  }
  0x60   :  { %3278 = vmatpush3.bf16.msra.mxu1 %v3551_v40  ;;  %1117 = vmatprep.subr.bf16.mxu0 %v3555_v42  ;;  %v3621_v40 = vld [vmem:[%s4836_s2 + $0x7c] ss:$12 sps:$4 sm:$0xff]   ;;  %v3624_v42 = vld [vmem:[%s4836_s2 + $0x64] ss:$12 sps:$4 sm:$0xff]  }
  0x61   :  { %3279 = vmatprep.subr.bf16.mxu1 %v3552_v41  ;;  %v3619_v41 = vld [vmem:[%s4836_s2 + $0x78] ss:$12 sps:$4 sm:$0xff]  }
  0x63   :  { %1118 = vmatpush2.bf16.msra.mxu0 %v3553_v43  ;;  %v3622_v43 = vld [vmem:[%s4836_s2 + $0x60] ss:$12 sps:$4 sm:$0xff]  }
  0x64   :  { %3280 = vmatpush3.bf16.msra.mxu1 %v3556_v45  ;;  %1119 = vmatprep.subr.bf16.mxu0 %v3560_v48  ;;  %v3625_v45 = vld [vmem:[%s4836_s2 + $0x48] ss:$12 sps:$4 sm:$0xff]  }
  0x65   :  { %3281 = vmatprep.subr.bf16.mxu1 %v3557_v46 }
  0x67   :  { %1120 = vmatpush2.bf16.msra.mxu0 %v3558_v49  ;;  %v3630_v49 = vld [vmem:[%s4836_s2 + $0x34] ss:$12 sps:$4 sm:$0xff]  }
  0x68   :  { %3282 = vmatpush3.bf16.msra.mxu1 %v3561_v50  ;;  %1121 = vmatprep.subr.bf16.mxu0 %v3565_v53  ;;  %v3628_v53 = vld [vmem:[%s4836_s2 + $0x30] ss:$12 sps:$4 sm:$0xff]  }
  0x69   :  { %3289 = vmatprep.subr.bf16.mxu1 %v3562_v51 }
  0x6b   :  { %1216 = vmatmul.mubr.bf16.vlgmr.msra.gmra.mxu1 %v4033_v8  ;;  %1122 = vmatpush2.bf16.msra.mxu0 %v3563_v54  ;;  %v3590_v8 = vld [vmem:[%s4834_s1 + $0x3c4] ss:$12 sps:$4 sm:$0xff]  }
  0x6c   :  { %3290 = vmatpush3.bf16.msra.mxu1 %v3566_v55  ;;  %1123 = vmatprep.subr.bf16.mxu0 %v3570_v57  ;;  %v3633_v57 = vld [vmem:[%s4836_s2 + $0x1c] ss:$12 sps:$4 sm:$0xff]  }
  0x6d   :  { %3291 = vmatprep.subr.bf16.mxu1 %v3567_v56  ;;  %1255 = vmatprep.mubr.bf16.mxu1 %v3972_v52  ;;  %v3578_v52 = vld [vmem:[%s4834_s1 + $0x3f0] ss:$12 sps:$4 sm:$0xff]  }
  0x6f   :  { %1124 = vmatpush2.bf16.msra.mxu0 %v3568_v58 }
  0x70   :  { %3292 = vmatpush3.bf16.msra.mxu1 %v3571_v59  ;;  %1125 = vmatprep.subr.bf16.mxu0 %v3575_v61 }
  0x71   :  { %3293 = vmatprep.subr.bf16.mxu1 %v3572_v60  ;;  %v3631_v60 = vld [vmem:[%s4836_s2 + $0x18] ss:$12 sps:$4 sm:$0xff]  }
  0x73   :  { %1126 = vmatpush2.bf16.msra.mxu0 %v3573_v62  ;;  %v3636_v62 = vld [vmem:[%s4836_s2 + $0x4] ss:$12 sps:$4 sm:$0xff]  }
  0x74   :  { %3294 = vmatpush3.bf16.msra.mxu1 %v3576_v63  ;;  %1127 = vmatprep.subr.bf16.mxu0 %v3580_v1 }
  0x75   :  { %3295 = vmatprep.subr.bf16.mxu1 %v3577_v0  ;;  %v3634_v0 = vld [vmem:[%s4836_s2] ss:$12 sps:$4 sm:$0xff]  }
  0x77   :  { %1128 = vmatpush2.bf16.msra.mxu0 %v3578_v52  ;;  %v3639_v52 = vld [vmem:[%s4836_s2 + $0x16c] ss:$12 sps:$4 sm:$0xff]  }
  0x78   :  { %3296 = vmatpush3.bf16.msra.mxu1 %v3581_v2  ;;  %1129 = vmatprep.subr.bf16.mxu0 %v3585_v4  ;;  %v3642_v4 = vld [vmem:[%s4836_s2 + $0x154] ss:$12 sps:$4 sm:$0xff]  }
  0x79   :  { %3297 = vmatprep.subr.bf16.mxu1 %v3582_v3  ;;  %v3637_v3 = vld [vmem:[%s4836_s2 + $0x168] ss:$12 sps:$4 sm:$0xff]  }
  0x7b   :  { %1130 = vmatpush2.bf16.msra.mxu0 %v3583_v5  ;;  %v3640_v5 = vld [vmem:[%s4836_s2 + $0x150] ss:$12 sps:$4 sm:$0xff]  }
  0x7c   :  { %3298 = vmatpush3.bf16.msra.mxu1 %v3586_v6  ;;  %1131 = vmatprep.subr.bf16.mxu0 %v3590_v8  ;;  %v3645_v6 = vld [vmem:[%s4836_s2 + $0x13c] ss:$12 sps:$4 sm:$0xff]   ;;  %v3648_v8 = vld [vmem:[%s4836_s2 + $0x124] ss:$12 sps:$4 sm:$0xff]  }
  0x7d   :  { %3299 = vmatprep.subr.bf16.mxu1 %v3587_v7  ;;  %v3643_v7 = vld [vmem:[%s4836_s2 + $0x138] ss:$12 sps:$4 sm:$0xff]  }
  0x7f   :  { %1132 = vmatpush2.bf16.msra.mxu0 %v3588_v10  ;;  %v3646_v10 = vld [vmem:[%s4836_s2 + $0x120] ss:$12 sps:$4 sm:$0xff]  }
  0x80   :  { %3300 = vmatpush3.bf16.msra.mxu1 %v3591_v11  ;;  %3311 = vmatprep.subr.bf16.mxu0 %v3594_v14  ;;  %v3651_v11 = vld [vmem:[%s4836_s2 + $0x10c] ss:$12 sps:$4 sm:$0xff]   ;;  %v3654_v14 = vld [vmem:[%s4836_s2 + $0x1b0] ss:$12 sps:$4 sm:$0x3f]  }
  0x81   :  { %3301 = vmatprep.subr.bf16.mxu1 %v3592_v13  ;;  %v3649_v13 = vld [vmem:[%s4836_s2 + $0x108] ss:$12 sps:$4 sm:$0xff]  }
  0x82   :  { %1134 = vmatmul.mubr.bf16.vlgmr.msra.gmra.mxu0 %v32_v15 }
  0x83   :  { %3312 = vmatpush3.bf16.msra.mxu0 %v3595_v18  ;;  %1295 = vmatprep.mubr.bf16.mxu0 %v4150_v47  ;;  %v1894_v18 = vsel %vm1892_vm2, %v3654_v14, 0 }
  0x84   :  { %3302 = vmatpush3.bf16.msra.mxu1 %v3593_v17  ;;  %3313 = vmatprep.subr.bf16.mxu0 %v3598_v21  ;;  %v3660_v17 = vld [vmem:[%s4836_s2 + $0x19c] ss:$12 sps:$4 sm:$0xff]  }
  0x85   :  { %3303 = vmatprep.subr.bf16.mxu1 %v3596_v20  ;;  %v3658_v20 = vld [vmem:[%s4836_s2 + $0x198] ss:$12 sps:$4 sm:$0xff]   ;;  %v3655_v21 = vld [vmem:[%s4836_s2 + $0xf0] ss:$12 sps:$4 sm:$0xff]  }
  0x87   :  { %3314 = vmatpush3.bf16.msra.mxu0 %v3599_v23  ;;  %v3663_v23 = vld [vmem:[%s4836_s2 + $0xdc] ss:$12 sps:$4 sm:$0xff]  }
  0x88   :  { %3304 = vmatpush3.bf16.msra.mxu1 %v3597_v22  ;;  %3315 = vmatprep.subr.bf16.mxu0 %v3600_v24  ;;  %v3666_v22 = vld [vmem:[%s4836_s2 + $0x184] ss:$12 sps:$4 sm:$0xff]   ;;  %v3664_v24 = vld [vmem:[%s4836_s2 + $0x180] ss:$12 sps:$4 sm:$0xff]  }
  0x89   :  { %3387 = vmatprep.subr.bf16.mxu1 %v3784_v28 }
  0x8b   :  { %1256 = vmatmul.mubr.bf16.vlgmr.msra.gmra.mxu1 %v4035_v9  ;;  %3316 = vmatpush3.bf16.msra.mxu0 %v3601_v25  ;;  %v3605_v9 = vld [vmem:[%s4834_s1 + $0x350] ss:$12 sps:$4 sm:$0xff]   ;;  %v3661_v25 = vld [vmem:[%s4836_s2 + $0xd8] ss:$12 sps:$4 sm:$0xff]  }
  0x8c   :  { %3388 = vmatpush3.bf16.msra.mxu1 %v3612_v26  ;;  %3317 = vmatprep.subr.bf16.mxu0 %v3602_v27  ;;  %v3670_v26 = vld [vmem:[%s4836_s2 + $0x170] ss:$12 sps:$4 sm:$0xff]  }
  0x8d   :  { %3389 = vmatprep.mubr.msk.bf16.mxu1 %vm3785_vm1, %v3784_v28  ;;  %1902 = vmatprep.subr.bf16.mxu1 %v3615_v36  ;;  %v3669_v27 = vld [vmem:[%s4836_s2 + $0xc4] ss:$12 sps:$4 sm:$0xff]  }
  0x8f   :  { %3318 = vmatpush3.bf16.msra.mxu0 %v3603_v29 }
  0x90   :  { %3319 = vmatprep.subr.bf16.mxu0 %v3604_v30  ;;  %v3667_v30 = vld [vmem:[%s4836_s2 + $0xc0] ss:$12 sps:$4 sm:$0xff]  }
  0x93   :  { %3390 = vmatmul.mubr.msk.bf16.vlgmr.msra.gmra.mxu1 %vm1015_vm0, %v4064_v19  ;;  %3320 = vmatpush3.bf16.msra.mxu0 %v3605_v9  ;;  %v3610_v19 = vld [vmem:[%s4834_s1 + $0x3c8] ss:$12 sps:$4 sm:$0xff]  }
  0x94   :  { %3321 = vmatprep.subr.bf16.mxu0 %v3606_v31  ;;  %1903 = vmatpush1.bf16.msra.mxu1 %v3613_v37 }
  0x95   :  { %1904 = vmatprep.subr.bf16.mxu1 %v3618_v38 }
  0x97   :  { %3322 = vmatpush3.bf16.msra.mxu0 %v3607_v32 }
  0x98   :  { %3323 = vmatprep.subr.bf16.mxu0 %v3608_v33  ;;  %1905 = vmatpush1.bf16.msra.mxu1 %v3616_v39 }
  0x99   :  { %1906 = vmatprep.subr.bf16.mxu1 %v3621_v40 }
  0x9b   :  { %3324 = vmatpush3.bf16.msra.mxu0 %v3609_v34 }
  0x9c   :  { %3325 = vmatprep.subr.bf16.mxu0 %v3610_v19  ;;  %1907 = vmatpush1.bf16.msra.mxu1 %v3619_v41 }
  0x9d   :  { %1908 = vmatprep.subr.bf16.mxu1 %v3624_v42 }
  0x9f   :  { %3326 = vmatpush3.bf16.msra.mxu0 %v3611_v35 }
  0xa0   :  { %1909 = vmatpush1.bf16.msra.mxu1 %v3622_v43  ;;  %3198 = vmatprep.subr.msk.bf16.mxu0 %vm1892_vm2, %v3652_v12 }
  0xa1   :  { %1910 = vmatprep.subr.bf16.mxu1 %v3627_v44 }
  0xa2   :  { %1296 = vmatmul.mubr.bf16.vlgmr.msra.gmra.mxu0 %v32_v15  ;;  %v3657_v15 = vld [vmem:[%s4836_s2 + $0xf4] ss:$12 sps:$4 sm:$0xff]  }
  0xa3   :  { %1975 = vmatprep.mubr.bf16.mxu0 %v3783_v16  ;;  %1954 = vmatpush1.bf16.msra.mxu0 %v1894_v18 }
  0xa4   :  { %1911 = vmatpush1.bf16.msra.mxu1 %v3625_v45  ;;  %1955 = vmatprep.subr.bf16.mxu0 %v3660_v17 }
  0xa5   :  { %1912 = vmatprep.subr.bf16.mxu1 %v3630_v49 }
  0xa7   :  { %1956 = vmatpush1.bf16.msra.mxu0 %v3658_v20 }
  0xa8   :  { %1913 = vmatpush1.bf16.msra.mxu1 %v3628_v53  ;;  %1957 = vmatprep.subr.bf16.mxu0 %v3666_v22 }
  0xa9   :  { %1914 = vmatprep.subr.bf16.mxu1 %v3633_v57 }
  0xab   :  { %1958 = vmatpush1.bf16.msra.mxu0 %v3664_v24 }
  0xac   :  { %1915 = vmatpush1.bf16.msra.mxu1 %v3631_v60  ;;  %3335 = vmatprep.subr.bf16.mxu0 %v3670_v26 }
  0xad   :  { %1916 = vmatprep.subr.bf16.mxu1 %v3636_v62 }
  0xb0   :  { %1917 = vmatpush1.bf16.msra.mxu1 %v3634_v0 }
  0xb1   :  { %1918 = vmatprep.subr.bf16.mxu1 %v3639_v52 }
  0xb4   :  { %1919 = vmatpush2.bf16.msra.mxu1 %v3637_v3 }
  0xb5   :  { %1920 = vmatprep.subr.bf16.mxu1 %v3642_v4 }
  0xb8   :  { %1921 = vmatpush2.bf16.msra.mxu1 %v3640_v5 }
  0xb9   :  { %1922 = vmatprep.subr.bf16.mxu1 %v3645_v6 }
  0xbc   :  { %1923 = vmatpush2.bf16.msra.mxu1 %v3643_v7 }
  0xbd   :  { %1924 = vmatprep.subr.bf16.mxu1 %v3648_v8 }
  0xc0   :  { %1925 = vmatpush2.bf16.msra.mxu1 %v3646_v10 }
  0xc1   :  { %1926 = vmatprep.subr.bf16.mxu1 %v3651_v11 }
  0xc4   :  { %1927 = vmatpush2.bf16.msra.mxu1 %v3649_v13 }
  0xc5   :  { %1928 = vmatprep.subr.bf16.mxu1 %v3657_v15 }
  0xc8   :  { %1929 = vmatpush2.bf16.msra.mxu1 %v3655_v21 }
  0xc9   :  { %1930 = vmatprep.subr.bf16.mxu1 %v3663_v23 }
  0xcc   :  { %1931 = vmatpush2.bf16.msra.mxu1 %v3661_v25 }
  0xcd   :  { %1932 = vmatprep.subr.bf16.mxu1 %v3669_v27 }
  0xd0   :  { %1933 = vmatpush2.bf16.msra.mxu1 %v3667_v30 }
 0x102   :  { %v1053_v46 = vpop.f32.mrf.mxu0 }
 0x103   :  { %v1094_v47 = vpop.f32.mrf.mxu1 }
 0x104   :  { %v4340_v48 = vadd.f32 %v1094_v47, %v1053_v46  ;;  %v1055_v50 = vpop.f32.mrf.mxu0 }
 0x105   :  { %v1096_v51 = vpop.f32.mrf.mxu1 }
 0x106   :  { %v4348_v54 = vadd.f32 %v1096_v51, %v1055_v50  ;;  %v1057_v55 = vpop.f32.mrf.mxu0 }
 0x107   :  { %v1098_v56 = vpop.f32.mrf.mxu1 }
 0x108   :  { %v1058_v58 = vpop.f32.mrf.mxu0 }
 0x109   :  { %v1099_v59 = vpop.f32.mrf.mxu1 }
 0x10b   :  { %v4356_v61 = vpop.f32.mrf.mxu1 }
 0x10d   :  { %v4361_v63 = vpop.f32.mrf.mxu1 }
 0x10f   :  { %v1180_v1 = vpop.f32.mrf.mxu1 }
 0x111   :  { %v1181_v2 = vpop.f32.mrf.mxu1 }
 0x12b   :  { %v4434_v29 = vpop.f32.mrf.mxu1 }
 0x12d   :  { %v3284_v9 = vpop.f32.mrf.mxu1 }
 0x12e   :  { %v3285_v27 = vadd.f32 %v3284_v9, %v4434_v29 }
 0x12f   :  { %v3286_v31 = vpop.f32.mrf.mxu1 }
 0x131   :  { %v3287_v32 = vpop.f32.mrf.mxu1 }
 0x142   :  { %v1135_v33 = vpop.f32.mrf.mxu0 }
 0x143   :  { %v1136_v34 = vadd.f32 %v1135_v33, %v4340_v48 }
 0x144   :  { %v1137_v19 = vpop.f32.mrf.mxu0 }
 0x145   :  { %v4441_v35 = vadd.f32 %v4356_v61, %v1136_v34  ;;  %v1138_v36 = vadd.f32 %v1137_v19, %v4348_v54 }
 0x146   :  { %v1139_v37 = vpop.f32.mrf.mxu0 }
 0x147   :  { %v1346_v38 = vrot.slane %v4441_v35, 4  ;;  %v1369_v39 = vmul.f32 %v4441_v35, %v4441_v35  ;;  %v4448_v40 = vadd.f32 %v4361_v63, %v1138_v36 }
 0x148   :  { %v1140_v41 = vpop.f32.mrf.mxu0 }
 0x149   :  { %v1347_v42 = vadd.f32 %v1346_v38, %v4441_v35  ;;  %v1372_v43 = vrot.slane %v1369_v39, 4  ;;  %v1352_v44 = vrot.slane %v4448_v40, 4  ;;  %v1370_v45 = vmul.f32 %v4448_v40, %v4448_v40 }
 0x14b   :  { %v3305_v46 = vpop.f32.mrf.mxu1  ;;  %v1348_v47 = vrot.slane %v1347_v42, 2  ;;  %v1373_v48 = vadd.f32 %v1372_v43, %v1369_v39  ;;  %v1353_v49 = vadd.f32 %v1352_v44, %v4448_v40  ;;  %v1378_v50 = vrot.slane %v1370_v45, 4 }
 0x14d   :  { %v3306_v51 = vpop.f32.mrf.mxu1  ;;  %v1349_v53 = vadd.f32 %v1348_v47, %v1347_v42  ;;  %v1374_v54 = vrot.slane %v1373_v48, 2  ;;  %v1354_v55 = vrot.slane %v1353_v49, 2  ;;  %v1379_v56 = vadd.f32 %v1378_v50, %v1370_v45 }
 0x14e   :  { %v3307_v25 = vadd.f32 %v3306_v51, %v3305_v46 }
 0x14f   :  { %v3308_v57 = vpop.f32.mrf.mxu1  ;;  %v1350_v58 = vrot.slane %v1349_v53, 1  ;;  %v1375_v59 = vadd.f32 %v1374_v54, %v1373_v48  ;;  %v1355_v60 = vadd.f32 %v1354_v55, %v1353_v49  ;;  %v1380_v61 = vrot.slane %v1379_v56, 2 }
 0x150   :  { %v1258_v31 = vadd.f32 %v3307_v25, %v3285_v27 }
 0x151   :  { %v3309_v62 = vpop.f32.mrf.mxu1  ;;  %v1351_v63 = vadd.f32 %v1350_v58, %v1349_v53  ;;  %v1376_v0 = vrot.slane %v1375_v59, 1  ;;  %v1356_v1 = vrot.slane %v1355_v60, 1  ;;  %v1381_v52 = vadd.f32 %v1380_v61, %v1379_v56 }
 0x152   :  { %v3786_v61 = vmov 1966171168  }
 0x153   :  { %v1337_v2 = vpop.f32.mrf.mxu1  ;;  %v4455_v3 = vmul.f32 0.125, %v1351_v63  ;;  %v1377_v4 = vadd.f32 %v1376_v0, %v1375_v59  ;;  %v1357_v5 = vadd.f32 %v1356_v1, %v1355_v60  ;;  %v1382_v6 = vrot.slane %v1381_v52, 1 }
 0x154   :  { %v1414_v62 = vunpack.c.l.s4 %v3786_v61  ;;  %v1416_v63 = vlaneseq  ;;  %v3688_v61 = vld [vmem:[%s4836_s2 + $0x188] ss:$12 sps:$4 sm:$0xff]  }
 0x155   :  { %v3391_v7 = vpop.f32.mrf.mxu1  ;;  %v1391_v8 = vmul.f32 0.125, %v1377_v4  ;;  %v1394_v10 = vmul.f32 %v4455_v3, %v4455_v3  ;;  %v4459_v11 = vmul.f32 0.125, %v1357_v5  ;;  %v1383_v12 = vadd.f32 %v1382_v6, %v1381_v52 }
 0x156   :  { %v1415_v0 = vunpack.c.0.s8 %v1414_v62  ;;  %v1417_v1 = vshrl.u32 %v1416_v63, 7  ;;  %v1343_v7 = vld [vmem:[%s4837_s4] ss:$8 sm:$0x7]  ;;  %v3691_v62 = vld [vmem:[%s4838_s3 + $0xac] ss:$12 sps:$4 sm:$0xff]  }
 0x157   :  { %v1340_v13 = vpop.f32.mrf.mxu1  ;;  %v1397_v14 = vsub.f32 %v1391_v8, %v1394_v10  ;;  %v1392_v15 = vmul.f32 0.125, %v1383_v12  ;;  %v1395_v17 = vmul.f32 %v4459_v11, %v4459_v11  ;;  %v3689_v63 = vld [vmem:[%s4838_s3 + $0xa8] ss:$12 sps:$4 sm:$0xff]   ;;  %2622 = vmatprep.subr.bf16.mxu1 %v3691_v62 }
 0x158   :  { %v4466_v52 = vsub.s32 %v1415_v0, %v1417_v1  ;;  %v4474_v10 = vsub.s32 2, %v1417_v1  ;;  %v4476_v12 = vsub.s32 0, %v1417_v1  ;;  %v4478_v13 = vsub.s32 1, %v1417_v1  ;;  %v3694_v0 = vld [vmem:[%s4838_s3 + $0x94] ss:$12 sps:$4 sm:$0xff]  }
 0x159   :  { %v3392_v18 = vpop.f32.mrf.mxu1  ;;  %v1400_v20 = vmax.f32 %v1397_v14, 0.0  ;;  %v1398_v21 = vsub.f32 %v1392_v15, %v1395_v17  ;;  %v3692_v1 = vld [vmem:[%s4838_s3 + $0x90] ss:$12 sps:$4 sm:$0xff]  }
 0x15b   :  { %v1403_v22 = vadd.f32 1e-05, %v1400_v20  ;;  %v1401_v23 = vmax.f32 %v1398_v21, 0.0 }
 0x15d   :  { %v1404_v24 = vadd.f32 1e-05, %v1401_v23  ;;  %3765 = vrsqrt.f32 %v1403_v22 }
 0x15f   :  { %3767 = vrsqrt.f32 %v1404_v24 }
 0x162   :  { %v3327_v26 = vpop.f32.mrf.mxu0 }
 0x164   :  { %v3328_v30 = vpop.f32.mrf.mxu0 }
 0x165   :  { %v3329_v32 = vadd.f32 %v3328_v30, %v3327_v26 }
 0x166   :  { %v3330_v33 = vpop.f32.mrf.mxu0 }
 0x167   :  { %v1298_v34 = vadd.f32 %v3329_v32, %v1258_v31  ;;  %v3140_v31 = vld [vmem:[%s4837_s4 + $0x1] ss:$8 sm:$0x7] }
 0x168   :  { %v3331_v19 = vpop.f32.mrf.mxu0 }
 0x169   :  { %v1338_v36 = vadd.f32 %v1337_v2, %v1298_v34 }
 0x16a   :  { %v3766_v37 = vpop.eup %3765 }
 0x16b   :  { %v1359_v38 = vsel %vm1358_vm3, %v1338_v36, 0.0  ;;  %v1371_v39 = vmul.f32 %v1338_v36, %v1338_v36 }
 0x16c   :  { %v3768_v41 = vpop.eup %3767  ;;  %v1360_v42 = vrot.slane %v1359_v38, 4 }
 0x16d   :  { %v1384_v43 = vsel %vm1358_vm3, %v1371_v39, 0.0  ;;  %v1412_v44 = vcombine.low %v3766_v37, %v3768_v41 }
 0x16e   :  { %v1361_v45 = vadd.f32 %v1360_v42, %v1359_v38  ;;  %v1385_v46 = vrot.slane %v1384_v43, 4  ;;  %v3671_v42 = vld [vmem:[%s4836_s2 + $0xb0] ss:$12 sps:$4 sm:$0xff]  }
 0x16f   :  { %v1419_v4 = vrot.slane %v1412_v44, %v4466_v52 }
 0x170   :  { %v1362_v29 = vrot.slane %v1361_v45, 2  ;;  %v1386_v9 = vadd.f32 %v1385_v46, %v1384_v43  ;;  %v3673_v46 = vld [vmem:[%s4836_s2 + $0x98] ss:$12 sps:$4 sm:$0xff]  }
 0x172   :  { %v1363_v47 = vadd.f32 %v1362_v29, %v1361_v45  ;;  %v1387_v48 = vrot.slane %v1386_v9, 2  ;;  %v3674_v29 = vld [vmem:[%s4836_s2 + $0x140] ss:$12 sps:$4 sm:$0xff]  }
 0x174   :  { %v1364_v49 = vrot.slane %v1363_v47, 1  ;;  %v1388_v50 = vadd.f32 %v1387_v48, %v1386_v9  ;;  %v3675_v9 = vld [vmem:[%s4836_s2 + $0x80] ss:$12 sps:$4 sm:$0xff]   ;;  %v3677_v48 = vld [vmem:[%s4836_s2 + $0x68] ss:$12 sps:$4 sm:$0xff]  }
 0x176   :  { %v1365_v51 = vadd.f32 %v1364_v49, %v1363_v47  ;;  %v1389_v53 = vrot.slane %v1388_v50, 1  ;;  %v3676_v47 = vld [vmem:[%s4836_s2 + $0x128] ss:$12 sps:$4 sm:$0xff]   ;;  %v3678_v49 = vld [vmem:[%s4836_s2 + $0x110] ss:$12 sps:$4 sm:$0xff]  }
 0x178   :  { %v1368_v54 = vmul.f32 0.125, %v1365_v51  ;;  %v1390_v55 = vadd.f32 %v1389_v53, %v1388_v50  ;;  %v3679_v50 = vld [vmem:[%s4836_s2 + $0x50] ss:$12 sps:$4 sm:$0xff]   ;;  %v3680_v51 = vld [vmem:[%s4836_s2 + $0xf8] ss:$12 sps:$4 sm:$0xff]  }
 0x179   :  { %v3681_v53 = vld [vmem:[%s4836_s2 + $0x38] ss:$12 sps:$4 sm:$0xff]  }
 0x17a   :  { %v1393_v56 = vmul.f32 0.125, %v1390_v55  ;;  %v1396_v57 = vmul.f32 %v1368_v54, %v1368_v54  ;;  %v3683_v55 = vld [vmem:[%s4836_s2 + $0x20] ss:$12 sps:$4 sm:$0xff]  }
 0x17c   :  { %v1399_v58 = vsub.f32 %v1393_v56, %v1396_v57  ;;  %v3684_v56 = vld [vmem:[%s4836_s2 + $0xc8] ss:$12 sps:$4 sm:$0xff]  }
 0x17d   :  { %v3685_v57 = vld [vmem:[%s4836_s2 + $0x8] ss:$12 sps:$4 sm:$0xff]  }
 0x17e   :  { %v1402_v59 = vmax.f32 %v1399_v58, 0.0  ;;  %v3686_v58 = vld [vmem:[%s4836_s2 + $0x1b8] ss:$12 sps:$4 sm:$0x3f]  }
 0x180   :  { %v1405_v60 = vadd.f32 1e-05, %v1402_v59  ;;  %v1900_v59 = vsel %vm1892_vm2, %v3686_v58, 0 }
 0x182   :  { %3769 = vrsqrt.f32 %v1405_v60  ;;  %v3687_v60 = vld [vmem:[%s4836_s2 + $0x1a0] ss:$12 sps:$4 sm:$0xff]  }
 0x18f   :  { %v3770_v2 = vpop.eup %3769 }
 0x190   :  { %v1426_v5 = vrot.slane %v3770_v2, %v4466_v52  ;;  %v3695_v2 = vld [vmem:[%s4838_s3 + $0x78] ss:$12 sps:$4 sm:$0xff]  }
 0x192   :  { %v1427_v6 = vcombine.low %v1419_v4, %v1426_v5  ;;  %v3700_v4 = vld [vmem:[%s4838_s3 + $0x64] ss:$12 sps:$4 sm:$0xff]   ;;  %v3698_v5 = vld [vmem:[%s4838_s3 + $0x60] ss:$12 sps:$4 sm:$0xff]  }
 0x194   :  { %v1434_v8 = vrot.slane %v1427_v6, %v4466_v52  ;;  %v3703_v6 = vld [vmem:[%s4838_s3 + $0x4c] ss:$12 sps:$4 sm:$0xff]  }
 0x196   :  { %v1436_v14 = vmul.f32 %v1434_v8, %v1343_v7  ;;  %v3701_v7 = vld [vmem:[%s4838_s3 + $0x48] ss:$12 sps:$4 sm:$0xff]  }
 0x197   :  { %v3706_v8 = vld [vmem:[%s4838_s3 + $0x34] ss:$12 sps:$4 sm:$0xff]  }
 0x198   :  { %v1449_v15 = vrot.slane %v1436_v14, %v4474_v10  ;;  %v1441_v17 = vrot.slane %v1436_v14, %v4476_v12  ;;  %v1445_v18 = vrot.slane %v1436_v14, %v4478_v13  ;;  %v3704_v14 = vld [vmem:[%s4838_s3 + $0x30] ss:$12 sps:$4 sm:$0xff]  }
 0x19a   :  { %v1455_v20 = vmul.f32 %v1449_v15, %v1368_v54  ;;  %v1453_v21 = vmul.f32 %v1441_v17, %v4455_v3  ;;  %v1454_v22 = vmul.f32 %v1445_v18, %v4459_v11  ;;  %v1485_v23 = vmul.f32 %v1445_v18, %v4448_v40  ;;  %v3682_v54 = vld [vmem:[%s4836_s2 + $0xe0] ss:$12 sps:$4 sm:$0xff]   ;;  %v3712_v18 = vld [vmem:[%s4838_s3 + $0x4] ss:$12 sps:$4 sm:$0xff]  }
 0x19b   :  { %v1484_v24 = vmul.f32 %v1441_v17, %v4441_v35  ;;  %v1486_v3 = vmul.f32 %v1449_v15, %v1338_v36  ;;  %v3672_v36 = vld [vmem:[%s4836_s2 + $0x158] ss:$12 sps:$4 sm:$0xff]   ;;  %v3709_v15 = vld [vmem:[%s4838_s3 + $0x1c] ss:$12 sps:$4 sm:$0xff]  }
 0x19c   :  { %v1459_v25 = vcombine.low %v1453_v21, %v1454_v22  ;;  %v1473_v26 = vrot.slane %v1455_v20, %v4466_v52  ;;  %v3707_v17 = vld [vmem:[%s4838_s3 + $0x18] ss:$12 sps:$4 sm:$0xff]   ;;  %v3710_v20 = vld [vmem:[%s4838_s3] ss:$12 sps:$4 sm:$0xff]   ;;  %v3713_v22 = vld [vmem:[%s4838_s3 + $0x168] ss:$12 sps:$4 sm:$0xff]  }
 0x19d   :  { %v3715_v21 = vld [vmem:[%s4838_s3 + $0x16c] ss:$12 sps:$4 sm:$0xff]  }
 0x19e   :  { %v1466_v27 = vrot.slane %v1459_v25, %v4466_v52  ;;  %v3721_v25 = vld [vmem:[%s4838_s3 + $0x13c] ss:$12 sps:$4 sm:$0xff]  }
 0x1a0   :  { %v1474_v30 = vcombine.low %v1466_v27, %v1473_v26  ;;  %v3719_v26 = vld [vmem:[%s4838_s3 + $0x138] ss:$12 sps:$4 sm:$0xff]  }
 0x1a1   :  { %v3724_v27 = vld [vmem:[%s4838_s3 + $0x124] ss:$12 sps:$4 sm:$0xff]  }
 0x1a2   :  { %v1481_v32 = vrot.slane %v1474_v30, %v4466_v52  ;;  %v3722_v30 = vld [vmem:[%s4838_s3 + $0x120] ss:$12 sps:$4 sm:$0xff]  }
 0x1a4   :  { %v1483_v33 = vsub.f32 %v3140_v31, %v1481_v32  ;;  %v3727_v31 = vld [vmem:[%s4838_s3 + $0x10c] ss:$12 sps:$4 sm:$0xff]   ;;  %v3725_v32 = vld [vmem:[%s4838_s3 + $0x108] ss:$12 sps:$4 sm:$0xff]  }
 0x1a6   :  { %v1495_v11 = vrot.slane %v1483_v33, %v4478_v13  ;;  %v1499_v40 = vrot.slane %v1483_v33, %v4474_v10  ;;  %v1491_v35 = vrot.slane %v1483_v33, %v4476_v12  ;;  %v3728_v33 = vld [vmem:[%s4838_s3 + $0x1b4] ss:$12 sps:$4 sm:$0x3f]  }
 0x1a8   :  { %v1504_v34 = vadd.f32 %v1495_v11, %v1485_v23  ;;  %v1505_v19 = vadd.f32 %v1499_v40, %v1486_v3  ;;  %v1503_v37 = vadd.f32 %v1491_v35, %v1484_v24  ;;  %v3718_v23 = vld [vmem:[%s4838_s3 + $0x154] ss:$12 sps:$4 sm:$0xff]   ;;  %v3716_v24 = vld [vmem:[%s4838_s3 + $0x150] ss:$12 sps:$4 sm:$0xff]  }
 0x1a9   :  { %v3730_v3 = vld [vmem:[%s4838_s3 + $0x1b0] ss:$12 sps:$4 sm:$0x3f]   ;;  %v3733_v40 = vld [vmem:[%s4838_s3 + $0xf4] ss:$12 sps:$4 sm:$0xff]  }
 0x1aa   :  { %v1507_v38 = vmax.f32 %v1504_v34, 0.0  ;;  %v1508_v39 = vmax.f32 %v1505_v19, 0.0  ;;  %v1506_v41 = vmax.f32 %v1503_v37, 0.0  ;;  %v2614_v11 = vsel %vm1892_vm2, %v3730_v3, 0  ;;  %v3731_v35 = vld [vmem:[%s4838_s3 + $0xf0] ss:$12 sps:$4 sm:$0xff]  }
 0x1ab   :  { %v3736_v34 = vld [vmem:[%s4838_s3 + $0x19c] ss:$12 sps:$4 sm:$0xff]   ;;  %v3734_v19 = vld [vmem:[%s4838_s3 + $0x198] ss:$12 sps:$4 sm:$0xff]  }
 0x1ac   :  { %v1510_v43 = vpack.c.bf16 %v1507_v38, %v1507_v38  ;;  %v1511_v44 = vpack.c.bf16 %v1508_v39, %v1508_v39  ;;  %v1509_v45 = vpack.c.bf16 %v1506_v41, %v1506_v41  ;;  %v3739_v37 = vld [vmem:[%s4838_s3 + $0xdc] ss:$12 sps:$4 sm:$0xff]   ;;  %v3737_v38 = vld [vmem:[%s4838_s3 + $0xd8] ss:$12 sps:$4 sm:$0xff]   ;;  %v3740_v41 = vld [vmem:[%s4838_s3 + $0x180] ss:$12 sps:$4 sm:$0xff]  }
 0x1ad   :  { %v3742_v39 = vld [vmem:[%s4838_s3 + $0x184] ss:$12 sps:$4 sm:$0xff]  }
 0x1ae   :  { %1934 = vmatprep.mubr.bf16.mxu1 %v1510_v43  ;;  %3199 = vmatmul.mubr.msk.bf16.vlgmr.msra.gmra.mxu0 %vm1358_vm3, %v1511_v44 }
 0x1af   :  { %3336 = vmatpush3.bf16.msra.mxu0 %v3671_v42  ;;  %1935 = vmatmul.mubr.bf16.vlgmr.msra.gmra.mxu1 %v1509_v45  ;;  %v3745_v42 = vld [vmem:[%s4838_s3 + $0xc4] ss:$12 sps:$4 sm:$0xff]  }
 0x1b0   :  { %2016 = vmatprep.mubr.bf16.mxu0 %v1510_v43  ;;  %3337 = vmatprep.subr.bf16.mxu0 %v3672_v36  ;;  %v3743_v43 = vld [vmem:[%s4838_s3 + $0xc0] ss:$12 sps:$4 sm:$0xff]  }
 0x1b1   :  { %2623 = vmatpush1.bf16.msra.mxu1 %v3689_v63 }
 0x1b2   :  { %2624 = vmatprep.subr.bf16.mxu1 %v3694_v0 }
 0x1b3   :  { %3338 = vmatpush3.bf16.msra.mxu0 %v3673_v46 }
 0x1b4   :  { %3339 = vmatprep.subr.bf16.mxu0 %v3674_v29 }
 0x1b5   :  { %2625 = vmatpush1.bf16.msra.mxu1 %v3692_v1 }
 0x1b7   :  { %3340 = vmatpush3.bf16.msra.mxu0 %v3675_v9 }
 0x1b8   :  { %3341 = vmatprep.subr.bf16.mxu0 %v3676_v47 }
 0x1bb   :  { %3342 = vmatpush3.bf16.msra.mxu0 %v3677_v48 }
 0x1bc   :  { %3343 = vmatprep.subr.bf16.mxu0 %v3678_v49 }
 0x1bf   :  { %3344 = vmatpush3.bf16.msra.mxu0 %v3679_v50 }
 0x1c0   :  { %3345 = vmatprep.subr.bf16.mxu0 %v3680_v51 }
 0x1c3   :  { %3346 = vmatpush3.bf16.msra.mxu0 %v3681_v53 }
 0x1c4   :  { %3347 = vmatprep.subr.bf16.mxu0 %v3682_v54 }
 0x1c7   :  { %3348 = vmatpush3.bf16.msra.mxu0 %v3683_v55 }
 0x1c8   :  { %3349 = vmatprep.subr.bf16.mxu0 %v3684_v56 }
 0x1cb   :  { %3350 = vmatpush3.bf16.msra.mxu0 %v3685_v57 }
 0x1cc   :  { %3393 = vmatprep.subr.bf16.mxu0 %v3784_v28 }
 0x1ce   :  { %2017 = vmatmul.mubr.bf16.vlgmr.msra.gmra.mxu0 %v1509_v45 }
 0x1cf   :  { %3394 = vmatpush3.bf16.msra.mxu0 %v1900_v59  ;;  %3399 = vmatprep.mubr.msk.bf16.mxu0 %vm3785_vm1, %v3784_v28 }
 0x1d0   :  { %3395 = vmatprep.subr.bf16.mxu0 %v3784_v28 }
 0x1d3   :  { %3396 = vmatpush3.bf16.msra.mxu0 %v3687_v60 }
 0x1d4   :  { %3397 = vmatprep.subr.bf16.mxu0 %v3784_v28 }
 0x1d7   :  { %3398 = vmatpush3.bf16.msra.mxu0 %v3688_v61 }
 0x1d8   :  { %3260 = vmatprep.subr.msk.bf16.mxu0 %vm1892_vm2, %v3728_v33 }
 0x1da   :  { %3400 = vmatmul.mubr.msk.bf16.vlgmr.msra.gmra.mxu0 %vm1358_vm3, %v1511_v44  ;;  %v3746_v44 = vld [vmem:[%s4838_s3 + $0x170] ss:$12 sps:$4 sm:$0xff]  }
 0x1db   :  { %2695 = vmatprep.mubr.bf16.mxu0 %v3783_v16  ;;  %v3697_v16 = vld [vmem:[%s4838_s3 + $0x7c] ss:$12 sps:$4 sm:$0xff]   ;;  %2674 = vmatpush1.bf16.msra.mxu0 %v2614_v11 }
 0x1dc   :  { %2626 = vmatprep.subr.bf16.mxu1 %v3697_v16  ;;  %2675 = vmatprep.subr.bf16.mxu0 %v3736_v34 }
 0x1dd   :  { %2627 = vmatpush1.bf16.msra.mxu1 %v3695_v2 }
 0x1de   :  { %2628 = vmatprep.subr.bf16.mxu1 %v3700_v4 }
 0x1df   :  { %2676 = vmatpush1.bf16.msra.mxu0 %v3734_v19 }
 0x1e0   :  { %2677 = vmatprep.subr.bf16.mxu0 %v3742_v39 }
 0x1e1   :  { %2629 = vmatpush1.bf16.msra.mxu1 %v3698_v5 }
 0x1e2   :  { %2630 = vmatprep.subr.bf16.mxu1 %v3703_v6 }
 0x1e3   :  { %2678 = vmatpush1.bf16.msra.mxu0 %v3740_v41 }
 0x1e4   :  { %3361 = vmatprep.subr.bf16.mxu0 %v3746_v44 }
 0x1e5   :  { %2631 = vmatpush1.bf16.msra.mxu1 %v3701_v7 }
 0x1e6   :  { %2632 = vmatprep.subr.bf16.mxu1 %v3706_v8 }
 0x1e9   :  { %2633 = vmatpush1.bf16.msra.mxu1 %v3704_v14 }
 0x1ea   :  { %2634 = vmatprep.subr.bf16.mxu1 %v3709_v15 }
 0x1ed   :  { %2635 = vmatpush1.bf16.msra.mxu1 %v3707_v17 }
 0x1ee   :  { %2636 = vmatprep.subr.bf16.mxu1 %v3712_v18 }
 0x1f1   :  { %2637 = vmatpush1.bf16.msra.mxu1 %v3710_v20 }
 0x1f2   :  { %2638 = vmatprep.subr.bf16.mxu1 %v3715_v21 }
 0x1f5   :  { %2639 = vmatpush2.bf16.msra.mxu1 %v3713_v22 }
 0x1f6   :  { %2640 = vmatprep.subr.bf16.mxu1 %v3718_v23 }
 0x1f9   :  { %2641 = vmatpush2.bf16.msra.mxu1 %v3716_v24 }
 0x1fa   :  { %2642 = vmatprep.subr.bf16.mxu1 %v3721_v25 }
 0x1fd   :  { %2643 = vmatpush2.bf16.msra.mxu1 %v3719_v26 }
 0x1fe   :  { %2644 = vmatprep.subr.bf16.mxu1 %v3724_v27 }
 0x201   :  { %2645 = vmatpush2.bf16.msra.mxu1 %v3722_v30 }
 0x202   :  { %2646 = vmatprep.subr.bf16.mxu1 %v3727_v31 }
 0x205   :  { %2647 = vmatpush2.bf16.msra.mxu1 %v3725_v32 }
 0x206   :  { %2648 = vmatprep.subr.bf16.mxu1 %v3733_v40 }
 0x209   :  { %2649 = vmatpush2.bf16.msra.mxu1 %v3731_v35 }
 0x20a   :  { %2650 = vmatprep.subr.bf16.mxu1 %v3739_v37 }
 0x20d   :  { %2651 = vmatpush2.bf16.msra.mxu1 %v3737_v38 }
 0x20e   :  { %2652 = vmatprep.subr.bf16.mxu1 %v3745_v42 }
 0x211   :  { %2653 = vmatpush2.bf16.msra.mxu1 %v3743_v43 }
 0x26e   :  { %v1977_v45 = vpop.f32.mrf.mxu0 }
 0x26f   :  { %v1936_v36 = vpop.f32.mrf.mxu1 }
 0x270   :  { %v1979_v46 = vpop.f32.mrf.mxu0  ;;  %v4680_v51 = vadd.f32 %v1977_v45, %v1936_v36 }
 0x271   :  { %v1938_v29 = vpop.f32.mrf.mxu1 }
 0x272   :  { %v1981_v9 = vpop.f32.mrf.mxu0  ;;  %v4678_v50 = vadd.f32 %v1979_v46, %v1938_v29  ;;  %v2068_v55 = vrot.slane %v4680_v51, 4  ;;  %v2090_v56 = vmul.f32 %v4680_v51, %v4680_v51 }
 0x273   :  { %v1940_v47 = vpop.f32.mrf.mxu1 }
 0x274   :  { %v1982_v48 = vpop.f32.mrf.mxu0  ;;  %v2074_v53 = vrot.slane %v4678_v50, 4  ;;  %v2091_v54 = vmul.f32 %v4678_v50, %v4678_v50  ;;  %v2069_v59 = vadd.f32 %v2068_v55, %v4680_v51  ;;  %v2093_v60 = vrot.slane %v2090_v56, 4 }
 0x275   :  { %v1941_v49 = vpop.f32.mrf.mxu1 }
 0x276   :  { %v2075_v57 = vadd.f32 %v2074_v53, %v4678_v50  ;;  %v2099_v58 = vrot.slane %v2091_v54, 4  ;;  %v2070_v63 = vrot.slane %v2069_v59, 2  ;;  %v2094_v0 = vadd.f32 %v2093_v60, %v2090_v56 }
 0x278   :  { %v2076_v61 = vrot.slane %v2075_v57, 2  ;;  %v2100_v62 = vadd.f32 %v2099_v58, %v2091_v54  ;;  %v2071_v4 = vadd.f32 %v2070_v63, %v2069_v59  ;;  %v2095_v5 = vrot.slane %v2094_v0, 2 }
 0x27a   :  { %v2077_v1 = vadd.f32 %v2076_v61, %v2075_v57  ;;  %v2101_v16 = vrot.slane %v2100_v62, 2  ;;  %v2072_v15 = vrot.slane %v2071_v4, 1  ;;  %v2096_v17 = vadd.f32 %v2095_v5, %v2094_v0 }
 0x27c   :  { %v2078_v7 = vrot.slane %v2077_v1, 1  ;;  %v2102_v8 = vadd.f32 %v2101_v16, %v2100_v62  ;;  %v2073_v22 = vadd.f32 %v2072_v15, %v2071_v4  ;;  %v2097_v23 = vrot.slane %v2096_v17, 1 }
 0x27e   :  { %v2079_v20 = vadd.f32 %v2078_v7, %v2077_v1  ;;  %v2103_v21 = vrot.slane %v2102_v8, 1  ;;  %v2087_v31 = vmul.f32 0.125, %v2073_v22  ;;  %v2098_v32 = vadd.f32 %v2097_v23, %v2096_v17 }
 0x280   :  { %v2088_v25 = vmul.f32 0.125, %v2079_v20  ;;  %v2104_v26 = vadd.f32 %v2103_v21, %v2102_v8  ;;  %v2112_v38 = vmul.f32 0.125, %v2098_v32  ;;  %v2115_v39 = vmul.f32 %v2087_v31, %v2087_v31  ;;  %v3201_v8 = vld [vmem:[%s4837_s4 + $0x2] ss:$8 sm:$0x7] }
 0x282   :  { %v2113_v40 = vmul.f32 0.125, %v2104_v26  ;;  %v2116_v35 = vmul.f32 %v2088_v25, %v2088_v25  ;;  %v2118_v46 = vsub.f32 %v2112_v38, %v2115_v39 }
 0x284   :  { %v2119_v44 = vsub.f32 %v2113_v40, %v2116_v35  ;;  %v2121_v53 = vmax.f32 %v2118_v46, 0.0  ;;  %v3750_v46 = vld [vmem:[%s4838_s3 + $0x140] ss:$12 sps:$4 sm:$0xff]  }
 0x286   :  { %v2122_v47 = vmax.f32 %v2119_v44, 0.0  ;;  %v2124_v59 = vadd.f32 1e-05, %v2121_v53  ;;  %v3756_v53 = vld [vmem:[%s4838_s3 + $0xf8] ss:$12 sps:$4 sm:$0xff]  }
 0x288   :  { %v2125_v56 = vadd.f32 1e-05, %v2122_v47  ;;  %v3753_v47 = vld [vmem:[%s4838_s3 + $0x68] ss:$12 sps:$4 sm:$0xff]  }
 0x28a   :  { %3771 = vrsqrt.f32 %v2125_v56  ;;  %v3759_v56 = vld [vmem:[%s4838_s3 + $0x20] ss:$12 sps:$4 sm:$0xff]  }
 0x28b   :  { %3773 = vrsqrt.f32 %v2124_v59  ;;  %v3762_v59 = vld [vmem:[%s4838_s3 + $0x1b8] ss:$12 sps:$4 sm:$0x3f]  }
 0x28e   :  { %v3351_v2 = vpop.f32.mrf.mxu0 }
 0x290   :  { %v3352_v6 = vpop.f32.mrf.mxu0 }
 0x291   :  { %v3353_v24 = vadd.f32 %v3352_v6, %v3351_v2 }
 0x292   :  { %v3354_v14 = vpop.f32.mrf.mxu0 }
 0x294   :  { %v3355_v18 = vpop.f32.mrf.mxu0 }
 0x297   :  { %v3772_v1 = vpop.eup %3771 }
 0x298   :  { %v3774_v16 = vpop.eup %3773 }
 0x299   :  { %v2133_v2 = vcombine.low %v3774_v16, %v3772_v1 }
 0x29a   :  { %v2058_v27 = vpop.f32.mrf.mxu0 }
 0x29b   :  { %v4690_v30 = vadd.f32 %v3353_v24, %v2058_v27  ;;  %v2140_v5 = vrot.slane %v2133_v2, %v4466_v52 }
 0x29c   :  { %v3401_v33 = vpop.f32.mrf.mxu0 }
 0x29d   :  { %v2080_v3 = vsel %vm1358_vm3, %v4690_v30, 0.0  ;;  %v2092_v11 = vmul.f32 %v4690_v30, %v4690_v30  ;;  %v3202_v33 = vld [vmem:[%s4837_s4 + $0x3] ss:$8 sm:$0x7] }
 0x29e   :  { %v2081_v34 = vrot.slane %v2080_v3, 4  ;;  %v2061_v19 = vpop.f32.mrf.mxu0 }
 0x29f   :  { %v2105_v37 = vsel %vm1358_vm3, %v2092_v11, 0.0 }
 0x2a0   :  { %v2082_v41 = vadd.f32 %v2081_v34, %v2080_v3  ;;  %v2106_v42 = vrot.slane %v2105_v37, 4  ;;  %v3402_v43 = vpop.f32.mrf.mxu0 }
 0x2a2   :  { %v2083_v45 = vrot.slane %v2082_v41, 2  ;;  %v2107_v36 = vadd.f32 %v2106_v42, %v2105_v37 }
 0x2a4   :  { %v2084_v29 = vadd.f32 %v2083_v45, %v2082_v41  ;;  %v2108_v9 = vrot.slane %v2107_v36, 2 }
 0x2a6   :  { %v2085_v48 = vrot.slane %v2084_v29, 1  ;;  %v2109_v49 = vadd.f32 %v2108_v9, %v2107_v36  ;;  %v3748_v36 = vld [vmem:[%s4838_s3 + $0x158] ss:$12 sps:$4 sm:$0xff]   ;;  %v3752_v9 = vld [vmem:[%s4838_s3 + $0x128] ss:$12 sps:$4 sm:$0xff]  }
 0x2a8   :  { %v2086_v54 = vadd.f32 %v2085_v48, %v2084_v29  ;;  %v2110_v55 = vrot.slane %v2109_v49, 1  ;;  %v3751_v29 = vld [vmem:[%s4838_s3 + $0x80] ss:$12 sps:$4 sm:$0xff]   ;;  %v3754_v48 = vld [vmem:[%s4838_s3 + $0x110] ss:$12 sps:$4 sm:$0xff]  }
 0x2aa   :  { %v2089_v57 = vmul.f32 0.125, %v2086_v54  ;;  %v2111_v58 = vadd.f32 %v2110_v55, %v2109_v49  ;;  %v3755_v49 = vld [vmem:[%s4838_s3 + $0x50] ss:$12 sps:$4 sm:$0xff]   ;;  %v3757_v54 = vld [vmem:[%s4838_s3 + $0x38] ss:$12 sps:$4 sm:$0xff]  }
 0x2ab   :  { %v3758_v55 = vld [vmem:[%s4838_s3 + $0xe0] ss:$12 sps:$4 sm:$0xff]  }
 0x2ac   :  { %v2114_v60 = vmul.f32 0.125, %v2111_v58  ;;  %v2117_v61 = vmul.f32 %v2089_v57, %v2089_v57  ;;  %v3761_v58 = vld [vmem:[%s4838_s3 + $0x8] ss:$12 sps:$4 sm:$0xff]  }
 0x2ae   :  { %v2120_v62 = vsub.f32 %v2114_v60, %v2117_v61  ;;  %v2620_v60 = vsel %vm1892_vm2, %v3762_v59, 0  ;;  %v3763_v61 = vld [vmem:[%s4838_s3 + $0x1a0] ss:$12 sps:$4 sm:$0xff]  }
 0x2b0   :  { %v2123_v63 = vmax.f32 %v2120_v62, 0.0  ;;  %v3764_v62 = vld [vmem:[%s4838_s3 + $0x188] ss:$12 sps:$4 sm:$0xff]  }
 0x2b2   :  { %v2126_v0 = vadd.f32 1e-05, %v2123_v63 }
 0x2b4   :  { %3775 = vrsqrt.f32 %v2126_v0 }
 0x2c1   :  { %v3776_v4 = vpop.eup %3775 }
 0x2c2   :  { %v2147_v6 = vrot.slane %v3776_v4, %v4466_v52 }
 0x2c4   :  { %v2148_v7 = vcombine.low %v2140_v5, %v2147_v6 }
 0x2c6   :  { %v2155_v14 = vrot.slane %v2148_v7, %v4466_v52 }
 0x2c8   :  { %v2157_v15 = vmul.f32 %v3201_v8, %v2155_v14 }
 0x2ca   :  { %v2162_v17 = vrot.slane %v2157_v15, %v4476_v12  ;;  %v2166_v18 = vrot.slane %v2157_v15, %v4478_v13  ;;  %v2170_v20 = vrot.slane %v2157_v15, %v4474_v10 }
 0x2cc   :  { %v2174_v21 = vmul.f32 %v2162_v17, %v2087_v31  ;;  %v2175_v22 = vmul.f32 %v2166_v18, %v2088_v25  ;;  %v2176_v23 = vmul.f32 %v2170_v20, %v2089_v57  ;;  %v2207_v40 = vmul.f32 %v2170_v20, %v4690_v30  ;;  %v3747_v30 = vld [vmem:[%s4838_s3 + $0xb0] ss:$12 sps:$4 sm:$0xff]   ;;  %v3760_v57 = vld [vmem:[%s4838_s3 + $0xc8] ss:$12 sps:$4 sm:$0xff]  }
 0x2cd   :  { %v2206_v35 = vmul.f32 %v2166_v18, %v4678_v50  ;;  %v2205_v34 = vmul.f32 %v2162_v17, %v4680_v51  ;;  %v3749_v51 = vld [vmem:[%s4838_s3 + $0x98] ss:$12 sps:$4 sm:$0xff]  }
 0x2ce   :  { %v2180_v24 = vcombine.low %v2174_v21, %v2175_v22  ;;  %v2194_v27 = vrot.slane %v2176_v23, %v4466_v52 }
 0x2d0   :  { %v2187_v26 = vrot.slane %v2180_v24, %v4466_v52 }
 0x2d2   :  { %v2195_v32 = vcombine.low %v2187_v26, %v2194_v27 }
 0x2d4   :  { %v2202_v3 = vrot.slane %v2195_v32, %v4466_v52 }
 0x2d6   :  { %v2204_v11 = vsub.f32 %v3202_v33, %v2202_v3 }
 0x2d8   :  { %v2220_v25 = vrot.slane %v2204_v11, %v4474_v10  ;;  %v2216_v31 = vrot.slane %v2204_v11, %v4478_v13  ;;  %v2212_v19 = vrot.slane %v2204_v11, %v4476_v12 }
 0x2da   :  { %v2226_v37 = vadd.f32 %v2220_v25, %v2207_v40  ;;  %v2225_v38 = vadd.f32 %v2216_v31, %v2206_v35  ;;  %v2224_v39 = vadd.f32 %v2212_v19, %v2205_v34 }
 0x2dc   :  { %v2229_v41 = vmax.f32 %v2226_v37, 0.0  ;;  %v2228_v42 = vmax.f32 %v2225_v38, 0.0  ;;  %v2227_v43 = vmax.f32 %v2224_v39, 0.0 }
 0x2de   :  { %v2232_v44 = vpack.c.bf16 %v2229_v41, %v2229_v41  ;;  %v2231_v50 = vpack.c.bf16 %v2228_v42, %v2228_v42  ;;  %v2230_v45 = vpack.c.bf16 %v2227_v43, %v2227_v43 }
 0x2e0   :  { %2654 = vmatprep.mubr.bf16.mxu1 %v2231_v50  ;;  %3261 = vmatmul.mubr.msk.bf16.vlgmr.msra.gmra.mxu0 %vm1358_vm3, %v2232_v44 }
 0x2e1   :  { %3362 = vmatpush3.bf16.msra.mxu0 %v3747_v30  ;;  %2655 = vmatmul.mubr.bf16.vlgmr.msra.gmra.mxu1 %v2230_v45 }
 0x2e2   :  { %2736 = vmatprep.mubr.bf16.mxu0 %v2231_v50  ;;  %3363 = vmatprep.subr.bf16.mxu0 %v3748_v36 }
 0x2e5   :  { %3364 = vmatpush3.bf16.msra.mxu0 %v3749_v51 }
 0x2e6   :  { %3365 = vmatprep.subr.bf16.mxu0 %v3750_v46 }
 0x2e9   :  { %3366 = vmatpush3.bf16.msra.mxu0 %v3751_v29 }
 0x2ea   :  { %3367 = vmatprep.subr.bf16.mxu0 %v3752_v9 }
 0x2ed   :  { %3368 = vmatpush3.bf16.msra.mxu0 %v3753_v47 }
 0x2ee   :  { %3369 = vmatprep.subr.bf16.mxu0 %v3754_v48 }
 0x2f1   :  { %3370 = vmatpush3.bf16.msra.mxu0 %v3755_v49 }
 0x2f2   :  { %3371 = vmatprep.subr.bf16.mxu0 %v3756_v53 }
 0x2f5   :  { %3372 = vmatpush3.bf16.msra.mxu0 %v3757_v54 }
 0x2f6   :  { %3373 = vmatprep.subr.bf16.mxu0 %v3758_v55 }
 0x2f9   :  { %3374 = vmatpush3.bf16.msra.mxu0 %v3759_v56 }
 0x2fa   :  { %3375 = vmatprep.subr.bf16.mxu0 %v3760_v57 }
 0x2fd   :  { %3376 = vmatpush3.bf16.msra.mxu0 %v3761_v58 }
 0x2fe   :  { %3403 = vmatprep.subr.bf16.mxu0 %v3784_v28 }
 0x300   :  { %2737 = vmatmul.mubr.bf16.vlgmr.msra.gmra.mxu0 %v2230_v45 }
 0x301   :  { %3404 = vmatpush3.bf16.msra.mxu0 %v2620_v60  ;;  %3409 = vmatprep.mubr.msk.bf16.mxu0 %vm3785_vm1, %v3784_v28 }
 0x302   :  { %3405 = vmatprep.subr.bf16.mxu0 %v3784_v28 }
 0x305   :  { %3406 = vmatpush3.bf16.msra.mxu0 %v3763_v61 }
 0x306   :  { %3407 = vmatprep.subr.bf16.mxu0 %v3784_v28 }
 0x309   :  { %3408 = vmatpush3.bf16.msra.mxu0 %v3764_v62 }
 0x30c   :  { %3410 = vmatmul.mubr.msk.bf16.vlgmr.msra.gmra.mxu0 %vm1358_vm3, %v2232_v44 }
 0x3a0   :  { %v2697_v63 = vpop.f32.mrf.mxu0 }
 0x3a1   :  { %v2656_v0 = vpop.f32.mrf.mxu1 }
 0x3a2   :  { %v2699_v1 = vpop.f32.mrf.mxu0  ;;  %v4782_v8 = vadd.f32 %v2697_v63, %v2656_v0 }
 0x3a3   :  { %v2658_v16 = vpop.f32.mrf.mxu1 }
 0x3a4   :  { %v2701_v2 = vpop.f32.mrf.mxu0  ;;  %v4780_v7 = vadd.f32 %v2699_v1, %v2658_v16  ;;  %v2788_v15 = vrot.slane %v4782_v8, 4  ;;  %v2810_v17 = vmul.f32 %v4782_v8, %v4782_v8 }
 0x3a5   :  { %v2660_v4 = vpop.f32.mrf.mxu1 }
 0x3a6   :  { %v2702_v5 = vpop.f32.mrf.mxu0  ;;  %v2794_v14 = vrot.slane %v4780_v7, 4  ;;  %v2811_v28 = vmul.f32 %v4780_v7, %v4780_v7  ;;  %v2789_v21 = vadd.f32 %v2788_v15, %v4782_v8  ;;  %v2813_v22 = vrot.slane %v2810_v17, 4 }
 0x3a7   :  { %v2661_v6 = vpop.f32.mrf.mxu1 }
 0x3a8   :  { %v2795_v18 = vadd.f32 %v2794_v14, %v4780_v7  ;;  %v2819_v20 = vrot.slane %v2811_v28, 4  ;;  %v2790_v26 = vrot.slane %v2789_v21, 2  ;;  %v2814_v27 = vadd.f32 %v2813_v22, %v2810_v17 }
 0x3aa   :  { %v2796_v23 = vrot.slane %v2795_v18, 2  ;;  %v2820_v24 = vadd.f32 %v2819_v20, %v2811_v28  ;;  %v2791_v11 = vadd.f32 %v2790_v26, %v2789_v21  ;;  %v2815_v40 = vrot.slane %v2814_v27, 2 }
 0x3ac   :  { %v2797_v32 = vadd.f32 %v2796_v23, %v2795_v18  ;;  %v2821_v33 = vrot.slane %v2820_v24, 2  ;;  %v2792_v19 = vrot.slane %v2791_v11, 1  ;;  %v2816_v37 = vadd.f32 %v2815_v40, %v2814_v27 }
 0x3ae   :  { %v2798_v25 = vrot.slane %v2797_v32, 1  ;;  %v2822_v31 = vadd.f32 %v2821_v33, %v2820_v24  ;;  %v2793_v42 = vadd.f32 %v2792_v19, %v2791_v11  ;;  %v2817_v43 = vrot.slane %v2816_v37, 1 }
 0x3b0   :  { %v2799_v39 = vadd.f32 %v2798_v25, %v2797_v32  ;;  %v2823_v41 = vrot.slane %v2822_v31, 1  ;;  %v2807_v51 = vmul.f32 0.125, %v2793_v42  ;;  %v2818_v46 = vadd.f32 %v2817_v43, %v2816_v37  ;;  %v3263_v25 = vld [vmem:[%s4837_s4 + $0x4] ss:$8 sm:$0x7] }
 0x3b2   :  { %v2808_v44 = vmul.f32 0.125, %v2799_v39  ;;  %v2824_v50 = vadd.f32 %v2823_v41, %v2822_v31  ;;  %v2832_v56 = vmul.f32 0.125, %v2818_v46  ;;  %v2835_v57 = vmul.f32 %v2807_v51, %v2807_v51  ;;  %v3264_v46 = vld [vmem:[%s4837_s4 + $0x5] ss:$8 sm:$0x7] }
 0x3b4   :  { %v2833_v48 = vmul.f32 0.125, %v2824_v50  ;;  %v2836_v49 = vmul.f32 %v2808_v44, %v2808_v44  ;;  %v2838_v0 = vsub.f32 %v2832_v56, %v2835_v57 }
 0x3b6   :  { %v2839_v61 = vsub.f32 %v2833_v48, %v2836_v49  ;;  %v2841_v6 = vmax.f32 %v2838_v0, 0.0 }
 0x3b8   :  { %v2842_v2 = vmax.f32 %v2839_v61, 0.0  ;;  %v2844_v20 = vadd.f32 1e-05, %v2841_v6 }
 0x3ba   :  { %v2845_v15 = vadd.f32 1e-05, %v2842_v2 }
 0x3bc   :  { %3777 = vrsqrt.f32 %v2845_v15 }
 0x3bd   :  { %3779 = vrsqrt.f32 %v2844_v20 }
 0x3c0   :  { %v3377_v3 = vpop.f32.mrf.mxu0 }
 0x3c2   :  { %v3378_v35 = vpop.f32.mrf.mxu0 }
 0x3c3   :  { %v3379_v30 = vadd.f32 %v3378_v35, %v3377_v3 }
 0x3c4   :  { %v3380_v34 = vpop.f32.mrf.mxu0 }
 0x3c6   :  { %v3381_v38 = vpop.f32.mrf.mxu0 }
 0x3c9   :  { %v3778_v27 = vpop.eup %3777 }
 0x3ca   :  { %v3780_v32 = vpop.eup %3779 }
 0x3cb   :  { %v2853_v33 = vcombine.low %v3780_v32, %v3778_v27 }
 0x3cc   :  { %v2778_v45 = vpop.f32.mrf.mxu0 }
 0x3cd   :  { %v4792_v36 = vadd.f32 %v3379_v30, %v2778_v45  ;;  %v2860_v11 = vrot.slane %v2853_v33, %v4466_v52 }
 0x3ce   :  { %v3411_v29 = vpop.f32.mrf.mxu0 }
 0x3cf   :  { %v2800_v9 = vsel %vm1358_vm3, %v4792_v36, 0.0  ;;  %v2812_v47 = vmul.f32 %v4792_v36, %v4792_v36 }
 0x3d0   :  { %v2801_v53 = vrot.slane %v2800_v9, 4  ;;  %v2781_v54 = vpop.f32.mrf.mxu0 }
 0x3d1   :  { %v2825_v55 = vsel %vm1358_vm3, %v2812_v47, 0.0  ;;  %v3265_v47 = vld [vmem:[%s4837_s4 + $0x6] ss:$8 sm:$0x7] }
 0x3d2   :  { %v2802_v58 = vadd.f32 %v2801_v53, %v2800_v9  ;;  %v2826_v59 = vrot.slane %v2825_v55, 4  ;;  %v3412_v60 = vpop.f32.mrf.mxu0 }
 0x3d4   :  { %v2803_v62 = vrot.slane %v2802_v58, 2  ;;  %v2827_v63 = vadd.f32 %v2826_v59, %v2825_v55  ;;  %v2958_v55 = vrot.slane %v3265_v47, %v4476_v12  ;;  %v2966_v59 = vrot.slane %v3265_v47, %v4474_v10 }
 0x3d6   :  { %v2804_v1 = vadd.f32 %v2803_v62, %v2802_v58  ;;  %v2828_v16 = vrot.slane %v2827_v63, 2 }
 0x3d8   :  { %v2805_v4 = vrot.slane %v2804_v1, 1  ;;  %v2829_v5 = vadd.f32 %v2828_v16, %v2827_v63 }
 0x3da   :  { %v2806_v14 = vadd.f32 %v2805_v4, %v2804_v1  ;;  %v2830_v28 = vrot.slane %v2829_v5, 1 }
 0x3dc   :  { %v2809_v17 = vmul.f32 0.125, %v2806_v14  ;;  %v2831_v18 = vadd.f32 %v2830_v28, %v2829_v5 }
 0x3de   :  { %v2834_v21 = vmul.f32 0.125, %v2831_v18  ;;  %v2837_v22 = vmul.f32 %v2809_v17, %v2809_v17 }
 0x3e0   :  { %v2840_v23 = vsub.f32 %v2834_v21, %v2837_v22 }
 0x3e2   :  { %v2843_v24 = vmax.f32 %v2840_v23, 0.0 }
 0x3e4   :  { %v2846_v26 = vadd.f32 1e-05, %v2843_v24 }
 0x3e6   :  { %3781 = vrsqrt.f32 %v2846_v26 }
 0x3f3   :  { %v3782_v3 = vpop.eup %3781 }
 0x3f4   :  { %v2867_v40 = vrot.slane %v3782_v3, %v4466_v52 }
 0x3f6   :  { %v2868_v35 = vcombine.low %v2860_v11, %v2867_v40 }
 0x3f8   :  { %v2875_v31 = vrot.slane %v2868_v35, %v4466_v52 }
 0x3fa   :  { %v2877_v34 = vmul.f32 %v3263_v25, %v2875_v31 }
 0x3fc   :  { %v2890_v19 = vrot.slane %v2877_v34, %v4474_v10  ;;  %v2882_v37 = vrot.slane %v2877_v34, %v4476_v12  ;;  %v2886_v38 = vrot.slane %v2877_v34, %v4478_v13 }
 0x3fe   :  { %v2896_v39 = vmul.f32 %v2890_v19, %v2809_v17  ;;  %v2894_v41 = vmul.f32 %v2882_v37, %v2807_v51  ;;  %v2895_v42 = vmul.f32 %v2886_v38, %v2808_v44  ;;  %v2927_v51 = vmul.f32 %v2890_v19, %v4792_v36 }
 0x3ff   :  { %v2925_v44 = vmul.f32 %v2882_v37, %v4782_v8  ;;  %v2926_v48 = vmul.f32 %v2886_v38, %v4780_v7 }
 0x400   :  { %v2900_v43 = vcombine.low %v2894_v41, %v2895_v42  ;;  %v2914_v30 = vrot.slane %v2896_v39, %v4466_v52 }
 0x402   :  { %v2907_v50 = vrot.slane %v2900_v43, %v4466_v52 }
 0x404   :  { %v2915_v45 = vcombine.low %v2907_v50, %v2914_v30 }
 0x406   :  { %v2922_v29 = vrot.slane %v2915_v45, %v4466_v52  ;;  %v2962_v52 = vrot.slane %v3265_v47, %v4478_v13 }
 0x408   :  { %v2924_v9 = vsub.f32 %v3264_v46, %v2922_v29 }
 0x40a   :  { %v2932_v49 = vrot.slane %v2924_v9, %v4476_v12  ;;  %v2936_v53 = vrot.slane %v2924_v9, %v4478_v13  ;;  %v2940_v54 = vrot.slane %v2924_v9, %v4474_v10  ;;  %v3266_v13 = vld [vmem:[%s4837_s4 + $0x7] ss:$8 sm:$0x7] }
 0x40b   :  { %v2982_v16 = vrot.slane %v3266_v13, %v4476_v12 }
 0x40c   :  { %v2944_v56 = vadd.f32 %v2932_v49, %v2925_v44  ;;  %v2945_v57 = vadd.f32 %v2936_v53, %v2926_v48  ;;  %v2946_v58 = vadd.f32 %v2940_v54, %v2927_v51 }
 0x40e   :  { %v2947_v36 = vmax.f32 %v2944_v56, 0.0  ;;  %v2948_v60 = vmax.f32 %v2945_v57, 0.0  ;;  %v2949_v8 = vmax.f32 %v2946_v58, 0.0 }
 0x410   :  { %v2970_v61 = vmul.f32 %v2958_v55, %v2947_v36  ;;  %v2971_v7 = vmul.f32 %v2962_v52, %v2948_v60  ;;  %v2972_v62 = vmul.f32 %v2966_v59, %v2949_v8 }
 0x412   :  { %v2973_v63 = vadd.f32 %v2971_v7, %v2970_v61  ;;  %v2974_v0 = vsel %vm1358_vm3, %v2972_v62, 0.0 }
 0x414   :  { %v2975_v1 = vadd.f32 %v2974_v0, %v2973_v63 }
 0x416   :  { %2976 = vadd.xlane.f32.xlu0 %v2975_v1 }
 0x49f   :  { %v2977_v2 = vpop.xlane.xlu0 %2976 }
 0x4a0   :  { %v2984_v10 = vadd.f32 %v2982_v16, %v2977_v2 }
 0x4a2   :  { %2986 = vst.msk [vmem:[%s4839_s5] sm:$0xff] %vm2985_vm4, %v2984_v10 }

</bundles_post_ra>
